<compile_context>
chip_gen: v7x
topology: tpu7x:2x2x1
jax: 0.10.0
libtpu: 0.0.40
codegen_flags: <defaults>
</compile_context>

<pallas_src>
import functools

import jax
import jax.numpy as jnp
import numpy as np
from jax.experimental import pallas as pl
from jax.experimental.pallas import tpu as pltpu


def _round_up(x, m):
    return ((x + m - 1) // m) * m


def _vmem_limit(nbytes):
    # Raise the scoped VMEM limit to what the call actually needs (+margin).
    # Real usage must still fit v7x's 64 MiB physical VMEM; the x-projection
    # split keeps the stage kernel's footprint independent of the input dim.
    return int(min(max(nbytes * 1.25 + (4 << 20), 32 << 20), 100 << 20))


# ----------------------------------------------------------------------------
# Input 1x1 projection kernel: streams x over T-chunks (x never fully resident)
# ----------------------------------------------------------------------------
def _proj_kernel(x_ref, w_ref, o_ref, *, compute_dtype):
    o_ref[0] = jnp.dot(x_ref[0].astype(compute_dtype), w_ref[...],
                       preferred_element_type=jnp.float32)


def _input_projection(x, w_pad, *, t_chunk):
    """x: (B, T, dim) (already in compute dtype); w_pad: (dim, CP). -> (B,T,CP) f32."""
    B, T, dim = x.shape
    CP = w_pad.shape[1]
    tt = T if T <= t_chunk else t_chunk                       # 8-aligned chunk
    need = (2 * tt * dim * x.dtype.itemsize
            + 2 * dim * CP * w_pad.dtype.itemsize
            + 2 * tt * CP * 4)
    return pl.pallas_call(
        functools.partial(_proj_kernel, compute_dtype=w_pad.dtype),
        out_shape=jax.ShapeDtypeStruct((B, T, CP), jnp.float32),
        grid=(B, pl.cdiv(T, tt)),
        in_specs=[pl.BlockSpec((1, tt, dim), lambda b, t: (b, t, 0)),
                  pl.BlockSpec((dim, CP), lambda b, t: (0, 0))],
        out_specs=pl.BlockSpec((1, tt, CP), lambda b, t: (b, t, 0)),
        compiler_params=pltpu.CompilerParams(
            dimension_semantics=("parallel", "parallel"),
            vmem_limit_bytes=_vmem_limit(need)),
    )(x, w_pad)


# ----------------------------------------------------------------------------
# Fused single-stage kernel (input conv + L residual layers + output conv)
# ----------------------------------------------------------------------------
def _make_stage_kernel(layer_type, ks, num_layers, T, C, nc, pad_l, rows,
                       first_stage, use_features, compute_dtype):
    cd = compute_dtype

    def mm(a, b):      # bf16 (default) MXU operands, f32 accumulation
        return jnp.dot(a.astype(cd), b.astype(cd),
                       preferred_element_type=jnp.float32)

    def kernel(*refs):
        act_ref = refs[-1]                     # VMEM scratch: zero-padded activation
        o_ref = refs[-2]                       # (1, T, OUT_W) packed output
        it = iter(refs[:-2])
        if first_stage:
            prev_ref = None
            xp_ref = next(it)                  # streamed x projection
        else:
            prev_ref = next(it)                # previous stage's packed output
            xp_ref = next(it) if use_features else None
        mask_ref = next(it)
        in_ws_ref = None if first_stage else next(it)
        in_b_ref = next(it)
        wd_ref = next(it)
        bd_ref = next(it)
        w1_ref = next(it)
        b1_ref = next(it)
        out_w_ref = next(it)
        out_b_ref = next(it)

        mask = mask_ref[0]                                      # (T, 1) f32
        mask_c = jnp.broadcast_to(mask, (T, C))                 # hoisted broadcast

        # Zero only the pad borders; center rows are fully overwritten below.
        # (Done every grid step: with megacore-parallel batch, a core may never
        #  execute program_id==0, so a one-time init would be unsafe.)
        if pad_l:
            act_ref[:pad_l, :] = jnp.zeros((pad_l, C), cd)
        if rows > pad_l + T:
            act_ref[pad_l + T:, :] = jnp.zeros((rows - pad_l - T, C), cd)

        # -- stage input 1x1 conv (later stages fuse softmax(prev_logits)*mask) --
        if first_stage:
            cur = xp_ref[0][:, :C] + in_b_ref[...]
        else:
            prev_logits = prev_ref[0][:, C:C + nc]              # (T, nc) f32
            mx = jnp.max(prev_logits, axis=-1, keepdims=True)
            ex = jnp.exp(prev_logits - mx)
            soft = (ex / jnp.sum(ex, axis=-1, keepdims=True)) * mask
            cur = mm(soft, in_ws_ref[...]) + in_b_ref[...]
            if use_features:
                cur = cur + xp_ref[0][:, :C]                    # streamed x @ W_x
        cur = cur * mask_c                                      # (T, C) f32
        act_ref[pad_l:pad_l + T, :] = cur.astype(cd)

        # -- dilated residual layers: activation resident in VMEM the whole time --
        for i in range(num_layers):
            d = 2 ** i
            p = (ks // 2) * d
            # ks accumulated dots instead of a (T, ks*C) concat temp.
            h = bd_ref[i]                                       # (1, Cout) f32
            for k in range(ks):
                start = pad_l - p + k * d
                h = h + mm(act_ref[start:start + T, :], wd_ref[i, k])
            if layer_type == "base_dr":
                h = jnp.maximum(h, 0.0)                         # relu(conv_dilated)
            else:                                               # 'gated'
                h = h[:, :C] * jax.nn.sigmoid(h[:, C:])         # conv * sigmoid(gate)
            # TODO(synk): Dropout / Dropout1d are train-time stochastic; identity here.
            h = mm(h, w1_ref[i]) + b1_ref[i]                    # conv_1x1
            if layer_type == "gated":
                h = jnp.maximum(h, 0.0)
            cur = (cur + h) * mask_c
            act_ref[pad_l:pad_l + T, :] = cur.astype(cd)

        # -- packed lane-dense output: [features | logits | zero pad], f32 --
        logits = mm(cur, out_w_ref[...]) + out_b_ref[...]       # (T, OUT_W - C)
        packed = jnp.concatenate([cur, logits], axis=-1)
        o_ref[0] = (packed * mask).astype(o_ref.dtype)

    return kernel


def _fused_stage(stacked, mask, *, xproj, prev_comb, first_stage, use_features,
                 layer_type, ks, num_layers, C, nc, compute_dtype):
    B, T, _ = mask.shape
    OUT_W = C + stacked["out_w"].shape[1]
    max_pad = (ks // 2) * (2 ** (num_layers - 1)) if num_layers else 0
    pad_l = _round_up(max_pad, 8) if max_pad else 0             # aligned center store
    rows = _round_up(pad_l + T + max_pad, 8)

    kernel = _make_stage_kernel(layer_type, ks, num_layers, T, C, nc, pad_l, rows,
                                first_stage, use_features, compute_dtype)

    args, in_specs = [], []

    def add(arr, spec):
        args.append(arr)
        in_specs.append(spec)

    if first_stage:
        add(xproj, pl.BlockSpec((1, T, xproj.shape[-1]), lambda b: (b, 0, 0)))
    else:
        add(prev_comb, pl.BlockSpec((1, T, OUT_W), lambda b: (b, 0, 0)))
        if use_features:
            add(xproj, pl.BlockSpec((1, T, xproj.shape[-1]), lambda b: (b, 0, 0)))
    add(mask, pl.BlockSpec((1, T, 1), lambda b: (b, 0, 0)))
    names = (("in_b",) if first_stage else ("in_w", "in_b")) + \
            ("wd", "bd", "w1", "b1", "out_w", "out_b")
    for name in names:
        w = stacked[name]
        add(w, pl.BlockSpec(w.shape, lambda b, _n=w.ndim: (0,) * _n))

    # VMEM budget computed from the actual shapes (feedback item).
    itemsize = jnp.dtype(compute_dtype).itemsize
    need = rows * C * itemsize                                  # activation scratch
    need += 2 * 2 * T * OUT_W * 4                               # prev + out, dbl-buffered
    if xproj is not None:
        need += 2 * T * xproj.shape[-1] * 4
    need += 2 * T * 128 * 4                                     # (T,1) mask tiles to 128 lanes
    for name in names:
        w = stacked[name]
        need += 2 * w.size * w.dtype.itemsize

    return pl.pallas_call(
        kernel,
        out_shape=jax.ShapeDtypeStruct((B, T, OUT_W), jnp.float32),
        grid=(B,),
        in_specs=in_specs,
        out_specs=pl.BlockSpec((1, T, OUT_W), lambda b: (b, 0, 0)),
        scratch_shapes=[pltpu.VMEM((rows, C), compute_dtype)],
        compiler_params=pltpu.CompilerParams(
            dimension_semantics=("parallel",),
            vmem_limit_bytes=_vmem_limit(need)),
    )(*args)


# ----------------------------------------------------------------------------
# Parameter packing for the fused kernels (weights pre-cast to compute dtype)
# ----------------------------------------------------------------------------
def _stack_stage_params(sp, layer_type, C, nc, out_pad_cols, compute_dtype, first_stage):
    cd = compute_dtype
    wd_l, bd_l, w1_l, b1_l = [], [], [], []
    for lp in sp["layers"]:
        wd = lp["wd"]                                           # (ks, C, C)
        bd = lp["bd"]                                           # (1, C)
        if layer_type == "gated":
            wd = jnp.concatenate([wd, lp["wg"]], axis=-1)       # (ks, C, 2C)
            bd = jnp.concatenate([bd, lp["bg"]], axis=-1)       # (1, 2C)
        wd_l.append(wd)
        bd_l.append(bd)
        w1_l.append(lp["w1"])
        b1_l.append(lp["b1"])
    out_w = jnp.zeros((C, out_pad_cols), jnp.float32).at[:, :nc].set(sp["out_w"])
    out_b = jnp.zeros((1, out_pad_cols), jnp.float32).at[:, :nc].set(sp["out_b"])
    st = dict(in_b=sp["in_b"],                                  # biases stay f32
              wd=jnp.stack(wd_l).astype(cd), bd=jnp.stack(bd_l),
              w1=jnp.stack(w1_l).astype(cd), b1=jnp.stack(b1_l),
              out_w=out_w.astype(cd), out_b=out_b)
    if not first_stage:
        st["in_w"] = sp["in_w"][:nc, :].astype(cd)              # softmax part only
    return st


def _proj_weight(w, cp, compute_dtype):
    """Zero-pad the x-part of an input 1x1 conv weight to lane width cp."""
    dim, C = w.shape
    wp = jnp.zeros((dim, cp), jnp.float32).at[:, :C].set(w)
    return wp.astype(compute_dtype)


# ----------------------------------------------------------------------------
# Model forward (one streamed x-projection + one fused pallas_call per stage)
# ----------------------------------------------------------------------------
def multi_stage_forward(params, x_in, masks, *, layer_type, use_features,
                        compute_dtype=jnp.bfloat16, t_chunk=512):
    """x_in: (B, dim, T);  masks: (num_stages, B, 1, T)   (PyTorch NCW layout)."""
    num_stages = 1 + len(params["stages"])
    assert masks.shape[0] == num_stages
    C = params["stage1"]["in_w"].shape[1]               # num_f_maps
    nc = params["stage1"]["out_w"].shape[1]             # num_classes
    num_layers = len(params["stage1"]["layers"])
    ks = params["stage1"]["layers"][0]["wd"].shape[0]
    assert ks % 2 == 1, "residual add requires odd kernel_size"
    OUT_W = _round_up(C + nc, 128)
    CP = _round_up(C, 128)

    x = jnp.transpose(x_in, (0, 2, 1)).astype(compute_dtype)   # (B, T, dim), bf16 read
    masks_btc = jnp.transpose(masks, (0, 1, 3, 2))             # (S, B, T, 1)

    common = dict(layer_type=layer_type, ks=ks, num_layers=num_layers,
                  C=C, nc=nc, compute_dtype=compute_dtype)

    # Stage 1: stream x -> (B,T,CP) projection, then the fused stage kernel.
    st = _stack_stage_params(params["stage1"], layer_type, C, nc, OUT_W - C,
                             compute_dtype, first_stage=True)
    xp = _input_projection(x, _proj_weight(params["stage1"]["in_w"], CP, compute_dtype),
                           t_chunk=t_chunk)
    comb = _fused_stage(st, masks_btc[0], xproj=xp, prev_comb=None,
                        first_stage=True, use_features=False, **common)
    packed = [comb]
    for sn, sp in enumerate(params["stages"]):
        # Faithful to the reference: stage sn of self.stages reuses masks[sn].
        st = _stack_stage_params(sp, layer_type, C, nc, OUT_W - C,
                                 compute_dtype, first_stage=False)
        xp = None
        if use_features:
            xp = _input_projection(x, _proj_weight(sp["in_w"][nc:, :], CP, compute_dtype),
                                   t_chunk=t_chunk)
        comb = _fused_stage(st, masks_btc[sn], xproj=xp, prev_comb=comb,
                            first_stage=False, use_features=use_features, **common)
        packed.append(comb)

    allp = jnp.stack(packed)                                            # (S,B,T,OUT_W)
    frame_wise_pred = jnp.transpose(allp[..., C:C + nc], (0, 1, 3, 2))  # (S,B,nc,T)
    out_features = jnp.transpose(allp[..., :C], (0, 1, 3, 2))           # (S,B,C,T)
    return frame_wise_pred, out_features


# ----------------------------------------------------------------------------
# Deterministic parameter init (shapes follow the nn.Module __init__)
# ----------------------------------------------------------------------------
def _init_conv(key, cin, cout, ks=None):
    kw, kb = jax.random.split(key)
    fan_in = cin * (ks if ks is not None else 1)
    bound = 1.0 / np.sqrt(fan_in)
    shape = (cin, cout) if ks is None else (ks, cin, cout)
    w = jax.random.uniform(kw, shape, jnp.float32, -bound, bound)
    b = jax.random.uniform(kb, (1, cout), jnp.float32, -bound, bound)
    return w, b


def init_stage(key, layer_type, kernel_size, num_layers, num_f_maps, dim, num_classes):
    keys = jax.random.split(key, num_layers + 2)
    in_w, in_b = _init_conv(keys[0], dim, num_f_maps)
    layers = []
    for i in range(num_layers):
        lk = jax.random.split(keys[1 + i], 3)
        wd, bd = _init_conv(lk[0], num_f_maps, num_f_maps, kernel_size)
        w1, b1 = _init_conv(lk[1], num_f_maps, num_f_maps)
        lp = {"wd": wd, "bd": bd, "w1": w1, "b1": b1}
        if layer_type == "gated":
            wg, bg = _init_conv(lk[2], num_f_maps, num_f_maps, kernel_size)
            lp.update({"wg": wg, "bg": bg})
        layers.append(lp)
    out_w, out_b = _init_conv(keys[-1], num_f_maps, num_classes)
    return {"in_w": in_w, "in_b": in_b, "layers": layers, "out_w": out_w, "out_b": out_b}


def init_multi_stage(key, layer_type, kernel_size, num_stages, num_layers,
                     num_f_maps, input_dim, num_classes, use_features):
    keys = jax.random.split(key, num_stages)
    stage1 = init_stage(keys[0], layer_type, kernel_size, num_layers,
                        num_f_maps, input_dim, num_classes)
    stage_in_dim = num_classes + (input_dim if use_features else 0)
    stages = [init_stage(keys[s], layer_type, kernel_size, num_layers,
                         num_f_maps, stage_in_dim, num_classes)
              for s in range(1, num_stages)]
    return {"stage1": stage1, "stages": stages}


# ----------------------------------------------------------------------------
# Pure-JAX reference (mirrors the PyTorch module) for correctness checking
# ----------------------------------------------------------------------------
def _ref_dilated_conv(x, w, b, dilation):
    ks = w.shape[0]
    T = x.shape[1]
    pad = (ks // 2) * dilation
    xp = jnp.pad(x, ((0, 0), (pad, pad), (0, 0)))
    out = b
    for k in range(ks):
        out = out + jnp.einsum("btc,cd->btd",
                               xp[:, k * dilation:k * dilation + T, :], w[k])
    return out


def _ref_stage(sp, x, mask, layer_type):
    out = (jnp.einsum("btc,cd->btd", x, sp["in_w"]) + sp["in_b"]) * mask
    for i, lp in enumerate(sp["layers"]):
        d = 2 ** i
        if layer_type == "base_dr":
            h = jax.nn.relu(_ref_dilated_conv(out, lp["wd"], lp["bd"], d))
        else:
            conv = _ref_dilated_conv(out, lp["wd"], lp["bd"], d)
            gate = jax.nn.sigmoid(_ref_dilated_conv(out, lp["wg"], lp["bg"], d))
            h = conv * gate
        h = jnp.einsum("btc,cd->btd", h, lp["w1"]) + lp["b1"]
        if layer_type == "gated":
            h = jax.nn.relu(h)
        out = (out + h) * mask
    feats = out * mask
    logits = (jnp.einsum("btc,cd->btd", out, sp["out_w"]) + sp["out_b"]) * mask
    return logits, feats


def _ref_forward(params, x_in, masks, layer_type, use_features):
    x = jnp.transpose(x_in, (0, 2, 1))
    m = jnp.transpose(masks, (0, 1, 3, 2))
    out, f = _ref_stage(params["stage1"], x, m[0], layer_type)
    outs, feats = [out], [f]
    for sn, sp in enumerate(params["stages"]):
        soft = jax.nn.softmax(out, axis=-1) * m[sn]
        inp = jnp.concatenate([soft, x], axis=-1) if use_features else soft
        out, f = _ref_stage(sp, inp, m[sn], layer_type)
        outs.append(out)
        feats.append(f)
    return (jnp.transpose(jnp.stack(outs), (0, 1, 3, 2)),
            jnp.transpose(jnp.stack(feats), (0, 1, 3, 2)))


# ----------------------------------------------------------------------------
if __name__ == "__main__":
    kernel_size = 3
    num_stages = 2
    num_layers = 3
    num_f_maps = 32          # model_dim
    input_dim = 8
    num_classes = 6
    B, T = 2, 16

    key = jax.random.PRNGKey(0)
    kx, k1, k2 = jax.random.split(key, 3)
    x_in = jax.random.normal(kx, (B, input_dim, T), jnp.float32)      # PyTorch NCW
    masks = jnp.ones((num_stages, B, 1, T), jnp.float32)
    masks = masks.at[:, 1, :, 12:].set(0.0)                           # ragged sequence 1

    configs = (("base_dr", False, k1), ("gated", True, k2))
    all_params = {}

    # Default (bf16 MXU operand) path for both layer types, loose tolerance.
    for layer_type, use_features, kp in configs:
        params = init_multi_stage(kp, layer_type, kernel_size, num_stages,
                                  num_layers, num_f_maps, input_dim,
                                  num_classes, use_features)
        all_params[layer_type] = params
        fwd = jax.jit(functools.partial(multi_stage_forward,
                                        layer_type=layer_type,
                                        use_features=use_features))
        preds, feats = fwd(params, x_in, masks)
        jax.block_until_ready((preds, feats))

        assert preds.shape == (num_stages, B, num_classes, T)
        assert feats.shape == (num_stages, B, num_f_maps, T)

        ref_preds, ref_feats = _ref_forward(params, x_in, masks,
                                            layer_type, use_features)
        np.testing.assert_allclose(np.asarray(preds), np.asarray(ref_preds),
                                   rtol=1e-1, atol=1e-1)
        np.testing.assert_allclose(np.asarray(feats), np.asarray(ref_feats),
                                   rtol=1e-1, atol=1e-1)

    # f32 path for one config, tight tolerance (exactness of the kernel math).
    fwd32 = jax.jit(functools.partial(multi_stage_forward, layer_type="base_dr",
                                      use_features=False,
                                      compute_dtype=jnp.float32))
    preds, feats = fwd32(all_params["base_dr"], x_in, masks)
    jax.block_until_ready((preds, feats))
    ref_preds, ref_feats = _ref_forward(all_params["base_dr"], x_in, masks,
                                        "base_dr", False)
    np.testing.assert_allclose(np.asarray(preds), np.asarray(ref_preds),
                               rtol=2e-3, atol=2e-3)
    np.testing.assert_allclose(np.asarray(feats), np.asarray(ref_feats),
                               rtol=2e-3, atol=2e-3)

    print("KERNEL_OK")
</pallas_src>

<mosaic_0001>
module attributes {stable_mosaic.version = 11 : i64} {
  func.func @_proj_kernel(%arg0: i32, %arg1: i32, %arg2: memref<1x16x8xbf16, #tpu.memory_space<vmem>>, %arg3: memref<8x128xbf16, #tpu.memory_space<vmem>>, %arg4: memref<1x16x128xf32, #tpu.memory_space<vmem>>) attributes {dimension_semantics = [#tpu.dimension_semantics<parallel>, #tpu.dimension_semantics<parallel>], iteration_bounds = array<i64: 2, 1>, scalar_prefetch = 0 : i64, scratch_operands = 0 : i64, tpu.core_type = #tpu.core_type<tc>, window_params = [{transform_indices = @transform_0, window_bounds = array<i64: 1, 16, 8>}, {pipeline_mode = #tpu.pipeline_mode<synchronous>, transform_indices = @transform_1, window_bounds = array<i64: 8, 128>}, {transform_indices = @transform_2, window_bounds = array<i64: 1, 16, 128>}]} {
    %c0 = arith.constant 0 : index
    %c0_0 = arith.constant 0 : index
    %c0_1 = arith.constant 0 : index
    %0 = vector.load %arg2[%c0, %c0_0, %c0_1] : memref<1x16x8xbf16, #tpu.memory_space<vmem>>, vector<1x16x8xbf16>
    %1 = vector.shape_cast %0 : vector<1x16x8xbf16> to vector<16x8xbf16>
    %c0_2 = arith.constant 0 : index
    %c0_3 = arith.constant 0 : index
    %2 = vector.load %arg3[%c0_2, %c0_3] : memref<8x128xbf16, #tpu.memory_space<vmem>>, vector<8x128xbf16>
    %cst = arith.constant dense<0.000000e+00> : vector<16x128xf32>
    %3 = tpu.matmul %1, %2, %cst {dimension_numbers = #tpu.dot_dimension_numbers<[1], [0], [0], [1], [0, 0, 1, 1], [], []>} : vector<16x8xbf16>, vector<8x128xbf16>, vector<16x128xf32> -> vector<16x128xf32>
    %c0_4 = arith.constant 0 : index
    %c0_5 = arith.constant 0 : index
    %c0_6 = arith.constant 0 : index
    %4 = vector.load %arg4[%c0_4, %c0_5, %c0_6] : memref<1x16x128xf32, #tpu.memory_space<vmem>>, vector<1x16x128xf32>
    %5 = vector.shape_cast %4 : vector<1x16x128xf32> to vector<16x128xf32>
    %6 = vector.shape_cast %3 : vector<16x128xf32> to vector<1x16x128xf32>
    tpu.vector_store %arg4[%c0_4, %c0_5, %c0_6], %6 {strides = array<i32>} : memref<1x16x128xf32, #tpu.memory_space<vmem>>, vector<1x16x128xf32>,
    return
  }
  func.func @transform_0(%arg0: i32, %arg1: i32) -> (i32, i32, i32) {
    %c0_i32 = arith.constant 0 : i32
    %c0_i32_0 = arith.constant 0 : i32
    return %arg0, %arg1, %c0_i32 : i32, i32, i32
  }
  func.func @transform_1(%arg0: i32, %arg1: i32) -> (i32, i32) {
    %c0_i32 = arith.constant 0 : i32
    %c0_i32_0 = arith.constant 0 : i32
    %c0_i32_1 = arith.constant 0 : i32
    return %c0_i32, %c0_i32_0 : i32, i32
  }
  func.func @transform_2(%arg0: i32, %arg1: i32) -> (i32, i32, i32) {
    %c0_i32 = arith.constant 0 : i32
    %c0_i32_0 = arith.constant 0 : i32
    return %arg0, %arg1, %c0_i32 : i32, i32, i32
  }
}

module attributes {stable_mosaic.version = 11 : i64} {
  func.func @kernel(%arg0: i32, %arg1: memref<1x16x128xf32, #tpu.memory_space<vmem>>, %arg2: memref<1x16x1xf32, #tpu.memory_space<vmem>>, %arg3: memref<1x32xf32, #tpu.memory_space<vmem>>, %arg4: memref<3x3x32x32xbf16, #tpu.memory_space<vmem>>, %arg5: memref<3x1x32xf32, #tpu.memory_space<vmem>>, %arg6: memref<3x32x32xbf16, #tpu.memory_space<vmem>>, %arg7: memref<3x1x32xf32, #tpu.memory_space<vmem>>, %arg8: memref<32x96xbf16, #tpu.memory_space<vmem>>, %arg9: memref<1x96xf32, #tpu.memory_space<vmem>>, %arg10: memref<1x16x128xf32, #tpu.memory_space<vmem>>, %arg11: memref<32x32xbf16, #tpu.memory_space<vmem>>) attributes {dimension_semantics = [#tpu.dimension_semantics<parallel>], iteration_bounds = array<i64: 2>, scalar_prefetch = 0 : i64, scratch_operands = 1 : i64, tpu.core_type = #tpu.core_type<tc>, window_params = [{transform_indices = @transform_0, window_bounds = array<i64: 1, 16, 128>}, {transform_indices = @transform_1, window_bounds = array<i64: 1, 16, 1>}, {pipeline_mode = #tpu.pipeline_mode<synchronous>, transform_indices = @transform_2, window_bounds = array<i64: 1, 32>}, {pipeline_mode = #tpu.pipeline_mode<synchronous>, transform_indices = @transform_3, window_bounds = array<i64: 3, 3, 32, 32>}, {pipeline_mode = #tpu.pipeline_mode<synchronous>, transform_indices = @transform_4, window_bounds = array<i64: 3, 1, 32>}, {pipeline_mode = #tpu.pipeline_mode<synchronous>, transform_indices = @transform_5, window_bounds = array<i64: 3, 32, 32>}, {pipeline_mode = #tpu.pipeline_mode<synchronous>, transform_indices = @transform_6, window_bounds = array<i64: 3, 1, 32>}, {pipeline_mode = #tpu.pipeline_mode<synchronous>, transform_indices = @transform_7, window_bounds = array<i64: 32, 96>}, {pipeline_mode = #tpu.pipeline_mode<synchronous>, transform_indices = @transform_8, window_bounds = array<i64: 1, 96>}, {transform_indices = @transform_9, window_bounds = array<i64: 1, 16, 128>}]} {
    %c0 = arith.constant 0 : index
    %c0_0 = arith.constant 0 : index
    %c0_1 = arith.constant 0 : index
    %0 = vector.load %arg2[%c0, %c0_0, %c0_1] : memref<1x16x1xf32, #tpu.memory_space<vmem>>, vector<1x16x1xf32>
    %1 = vector.shape_cast %0 : vector<1x16x1xf32> to vector<16x1xf32>
    %2 = vector.shape_cast %1 : vector<16x1xf32> to vector<16x1xf32>
    %3 = vector.broadcast %2 : vector<16x1xf32> to vector<16x32xf32>
    %cst = arith.constant 0.000000e+00 : bf16
    %4 = vector.broadcast %cst : bf16 to vector<8x32xbf16>
    %c0_2 = arith.constant 0 : index
    %c0_3 = arith.constant 0 : index
    %5 = vector.load %arg11[%c0_2, %c0_3] : memref<32x32xbf16, #tpu.memory_space<vmem>>, vector<8x32xbf16>
    tpu.vector_store %arg11[%c0_2, %c0_3], %4 {strides = array<i32>} : memref<32x32xbf16, #tpu.memory_space<vmem>>, vector<8x32xbf16>,
    %cst_4 = arith.constant 0.000000e+00 : bf16
    %6 = vector.broadcast %cst_4 : bf16 to vector<8x32xbf16>
    %c24 = arith.constant 24 : index
    %c0_5 = arith.constant 0 : index
    %7 = vector.load %arg11[%c24, %c0_5] : memref<32x32xbf16, #tpu.memory_space<vmem>>, vector<8x32xbf16>
    tpu.vector_store %arg11[%c24, %c0_5], %6 {strides = array<i32>} : memref<32x32xbf16, #tpu.memory_space<vmem>>, vector<8x32xbf16>,
    %c0_6 = arith.constant 0 : index
    %c0_7 = arith.constant 0 : index
    %c0_8 = arith.constant 0 : index
    %8 = vector.load %arg1[%c0_6, %c0_7, %c0_8] : memref<1x16x128xf32, #tpu.memory_space<vmem>>, vector<1x16x128xf32>
    %9 = vector.shape_cast %8 : vector<1x16x128xf32> to vector<16x128xf32>
    %10 = vector.extract_strided_slice %9 {offsets = [0, 0], sizes = [16, 32], strides = [1, 1]} : vector<16x128xf32> to vector<16x32xf32>
    %c0_9 = arith.constant 0 : index
    %c0_10 = arith.constant 0 : index
    %11 = vector.load %arg3[%c0_9, %c0_10] : memref<1x32xf32, #tpu.memory_space<vmem>>, vector<1x32xf32>
    %12 = vector.broadcast %11 : vector<1x32xf32> to vector<16x32xf32>
    %13 = arith.addf %10, %12 : vector<16x32xf32>
    %14 = arith.mulf %13, %3 : vector<16x32xf32>
    %15 = arith.truncf %14 : vector<16x32xf32> to vector<16x32xbf16>
    %c8 = arith.constant 8 : index
    %c0_11 = arith.constant 0 : index
    %16 = vector.load %arg11[%c8, %c0_11] : memref<32x32xbf16, #tpu.memory_space<vmem>>, vector<16x32xbf16>
    tpu.vector_store %arg11[%c8, %c0_11], %15 {strides = array<i32>} : memref<32x32xbf16, #tpu.memory_space<vmem>>, vector<16x32xbf16>,
    %c0_12 = arith.constant 0 : index
    %c0_13 = arith.constant 0 : index
    %c0_14 = arith.constant 0 : index
    %17 = vector.load %arg5[%c0_12, %c0_13, %c0_14] : memref<3x1x32xf32, #tpu.memory_space<vmem>>, vector<1x1x32xf32>
    %18 = vector.shape_cast %17 : vector<1x1x32xf32> to vector<1x32xf32>
    %c7 = arith.constant 7 : index
    %c0_15 = arith.constant 0 : index
    %19 = vector.load %arg11[%c7, %c0_15] : memref<32x32xbf16, #tpu.memory_space<vmem>>, vector<16x32xbf16>
    %c0_16 = arith.constant 0 : index
    %c0_17 = arith.constant 0 : index
    %c0_18 = arith.constant 0 : index
    %c0_19 = arith.constant 0 : index
    %20 = vector.load %arg4[%c0_16, %c0_17, %c0_18, %c0_19] : memref<3x3x32x32xbf16, #tpu.memory_space<vmem>>, vector<1x1x32x32xbf16>
    %21 = vector.shape_cast %20 : vector<1x1x32x32xbf16> to vector<32x32xbf16>
    %cst_20 = arith.constant dense<0.000000e+00> : vector<16x32xf32>
    %22 = tpu.matmul %19, %21, %cst_20 {dimension_numbers = #tpu.dot_dimension_numbers<[1], [0], [0], [1], [0, 0, 1, 1], [], []>} : vector<16x32xbf16>, vector<32x32xbf16>, vector<16x32xf32> -> vector<16x32xf32>
    %23 = vector.broadcast %18 : vector<1x32xf32> to vector<16x32xf32>
    %24 = arith.addf %23, %22 : vector<16x32xf32>
    %c8_21 = arith.constant 8 : index
    %c0_22 = arith.constant 0 : index
    %25 = vector.load %arg11[%c8_21, %c0_22] : memref<32x32xbf16, #tpu.memory_space<vmem>>, vector<16x32xbf16>
    %c0_23 = arith.constant 0 : index
    %c1 = arith.constant 1 : index
    %c0_24 = arith.constant 0 : index
    %c0_25 = arith.constant 0 : index
    %26 = vector.load %arg4[%c0_23, %c1, %c0_24, %c0_25] : memref<3x3x32x32xbf16, #tpu.memory_space<vmem>>, vector<1x1x32x32xbf16>
    %27 = vector.shape_cast %26 : vector<1x1x32x32xbf16> to vector<32x32xbf16>
    %cst_26 = arith.constant dense<0.000000e+00> : vector<16x32xf32>
    %28 = tpu.matmul %25, %27, %cst_26 {dimension_numbers = #tpu.dot_dimension_numbers<[1], [0], [0], [1], [0, 0, 1, 1], [], []>} : vector<16x32xbf16>, vector<32x32xbf16>, vector<16x32xf32> -> vector<16x32xf32>
    %29 = arith.addf %24, %28 : vector<16x32xf32>
    %c9 = arith.constant 9 : index
    %c0_27 = arith.constant 0 : index
    %30 = vector.load %arg11[%c9, %c0_27] : memref<32x32xbf16, #tpu.memory_space<vmem>>, vector<16x32xbf16>
    %c0_28 = arith.constant 0 : index
    %c2 = arith.constant 2 : index
    %c0_29 = arith.constant 0 : index
    %c0_30 = arith.constant 0 : index
    %31 = vector.load %arg4[%c0_28, %c2, %c0_29, %c0_30] : memref<3x3x32x32xbf16, #tpu.memory_space<vmem>>, vector<1x1x32x32xbf16>
    %32 = vector.shape_cast %31 : vector<1x1x32x32xbf16> to vector<32x32xbf16>
    %cst_31 = arith.constant dense<0.000000e+00> : vector<16x32xf32>
    %33 = tpu.matmul %30, %32, %cst_31 {dimension_numbers = #tpu.dot_dimension_numbers<[1], [0], [0], [1], [0, 0, 1, 1], [], []>} : vector<16x32xbf16>, vector<32x32xbf16>, vector<16x32xf32> -> vector<16x32xf32>
    %34 = arith.addf %29, %33 : vector<16x32xf32>
    %cst_32 = arith.constant 0.000000e+00 : f32
    %35 = vector.broadcast %cst_32 : f32 to vector<16x32xf32>
    %36 = arith.maximumf %34, %35 : vector<16x32xf32>
    %c0_33 = arith.constant 0 : index
    %c0_34 = arith.constant 0 : index
    %c0_35 = arith.constant 0 : index
    %37 = vector.load %arg6[%c0_33, %c0_34, %c0_35] : memref<3x32x32xbf16, #tpu.memory_space<vmem>>, vector<1x32x32xbf16>
    %38 = vector.shape_cast %37 : vector<1x32x32xbf16> to vector<32x32xbf16>
    %39 = arith.truncf %36 : vector<16x32xf32> to vector<16x32xbf16>
    %cst_36 = arith.constant dense<0.000000e+00> : vector<16x32xf32>
    %40 = tpu.matmul %39, %38, %cst_36 {dimension_numbers = #tpu.dot_dimension_numbers<[1], [0], [0], [1], [0, 0, 1, 1], [], []>} : vector<16x32xbf16>, vector<32x32xbf16>, vector<16x32xf32> -> vector<16x32xf32>
    %c0_37 = arith.constant 0 : index
    %c0_38 = arith.constant 0 : index
    %c0_39 = arith.constant 0 : index
    %41 = vector.load %arg7[%c0_37, %c0_38, %c0_39] : memref<3x1x32xf32, #tpu.memory_space<vmem>>, vector<1x1x32xf32>
    %42 = vector.shape_cast %41 : vector<1x1x32xf32> to vector<1x32xf32>
    %43 = vector.broadcast %42 : vector<1x32xf32> to vector<16x32xf32>
    %44 = arith.addf %40, %43 : vector<16x32xf32>
    %45 = arith.addf %14, %44 : vector<16x32xf32>
    %46 = arith.mulf %45, %3 : vector<16x32xf32>
    %47 = arith.truncf %46 : vector<16x32xf32> to vector<16x32xbf16>
    %c8_40 = arith.constant 8 : index
    %c0_41 = arith.constant 0 : index
    %48 = vector.load %arg11[%c8_40, %c0_41] : memref<32x32xbf16, #tpu.memory_space<vmem>>, vector<16x32xbf16>
    tpu.vector_store %arg11[%c8_40, %c0_41], %47 {strides = array<i32>} : memref<32x32xbf16, #tpu.memory_space<vmem>>, vector<16x32xbf16>,
    %c1_42 = arith.constant 1 : index
    %c0_43 = arith.constant 0 : index
    %c0_44 = arith.constant 0 : index
    %49 = vector.load %arg5[%c1_42, %c0_43, %c0_44] : memref<3x1x32xf32, #tpu.memory_space<vmem>>, vector<1x1x32xf32>
    %50 = vector.shape_cast %49 : vector<1x1x32xf32> to vector<1x32xf32>
    %c6 = arith.constant 6 : index
    %c0_45 = arith.constant 0 : index
    %51 = vector.load %arg11[%c6, %c0_45] : memref<32x32xbf16, #tpu.memory_space<vmem>>, vector<16x32xbf16>
    %c1_46 = arith.constant 1 : index
    %c0_47 = arith.constant 0 : index
    %c0_48 = arith.constant 0 : index
    %c0_49 = arith.constant 0 : index
    %52 = vector.load %arg4[%c1_46, %c0_47, %c0_48, %c0_49] : memref<3x3x32x32xbf16, #tpu.memory_space<vmem>>, vector<1x1x32x32xbf16>
    %53 = vector.shape_cast %52 : vector<1x1x32x32xbf16> to vector<32x32xbf16>
    %cst_50 = arith.constant dense<0.000000e+00> : vector<16x32xf32>
    %54 = tpu.matmul %51, %53, %cst_50 {dimension_numbers = #tpu.dot_dimension_numbers<[1], [0], [0], [1], [0, 0, 1, 1], [], []>} : vector<16x32xbf16>, vector<32x32xbf16>, vector<16x32xf32> -> vector<16x32xf32>
    %55 = vector.broadcast %50 : vector<1x32xf32> to vector<16x32xf32>
    %56 = arith.addf %55, %54 : vector<16x32xf32>
    %c8_51 = arith.constant 8 : index
    %c0_52 = arith.constant 0 : index
    %57 = vector.load %arg11[%c8_51, %c0_52] : memref<32x32xbf16, #tpu.memory_space<vmem>>, vector<16x32xbf16>
    %c1_53 = arith.constant 1 : index
    %c1_54 = arith.constant 1 : index
    %c0_55 = arith.constant 0 : index
    %c0_56 = arith.constant 0 : index
    %58 = vector.load %arg4[%c1_53, %c1_54, %c0_55, %c0_56] : memref<3x3x32x32xbf16, #tpu.memory_space<vmem>>, vector<1x1x32x32xbf16>
    %59 = vector.shape_cast %58 : vector<1x1x32x32xbf16> to vector<32x32xbf16>
    %cst_57 = arith.constant dense<0.000000e+00> : vector<16x32xf32>
    %60 = tpu.matmul %57, %59, %cst_57 {dimension_numbers = #tpu.dot_dimension_numbers<[1], [0], [0], [1], [0, 0, 1, 1], [], []>} : vector<16x32xbf16>, vector<32x32xbf16>, vector<16x32xf32> -> vector<16x32xf32>
    %61 = arith.addf %56, %60 : vector<16x32xf32>
    %c10 = arith.constant 10 : index
    %c0_58 = arith.constant 0 : index
    %62 = vector.load %arg11[%c10, %c0_58] : memref<32x32xbf16, #tpu.memory_space<vmem>>, vector<16x32xbf16>
    %c1_59 = arith.constant 1 : index
    %c2_60 = arith.constant 2 : index
    %c0_61 = arith.constant 0 : index
    %c0_62 = arith.constant 0 : index
    %63 = vector.load %arg4[%c1_59, %c2_60, %c0_61, %c0_62] : memref<3x3x32x32xbf16, #tpu.memory_space<vmem>>, vector<1x1x32x32xbf16>
    %64 = vector.shape_cast %63 : vector<1x1x32x32xbf16> to vector<32x32xbf16>
    %cst_63 = arith.constant dense<0.000000e+00> : vector<16x32xf32>
    %65 = tpu.matmul %62, %64, %cst_63 {dimension_numbers = #tpu.dot_dimension_numbers<[1], [0], [0], [1], [0, 0, 1, 1], [], []>} : vector<16x32xbf16>, vector<32x32xbf16>, vector<16x32xf32> -> vector<16x32xf32>
    %66 = arith.addf %61, %65 : vector<16x32xf32>
    %cst_64 = arith.constant 0.000000e+00 : f32
    %67 = vector.broadcast %cst_64 : f32 to vector<16x32xf32>
    %68 = arith.maximumf %66, %67 : vector<16x32xf32>
    %c1_65 = arith.constant 1 : index
    %c0_66 = arith.constant 0 : index
    %c0_67 = arith.constant 0 : index
    %69 = vector.load %arg6[%c1_65, %c0_66, %c0_67] : memref<3x32x32xbf16, #tpu.memory_space<vmem>>, vector<1x32x32xbf16>
    %70 = vector.shape_cast %69 : vector<1x32x32xbf16> to vector<32x32xbf16>
    %71 = arith.truncf %68 : vector<16x32xf32> to vector<16x32xbf16>
    %cst_68 = arith.constant dense<0.000000e+00> : vector<16x32xf32>
    %72 = tpu.matmul %71, %70, %cst_68 {dimension_numbers = #tpu.dot_dimension_numbers<[1], [0], [0], [1], [0, 0, 1, 1], [], []>} : vector<16x32xbf16>, vector<32x32xbf16>, vector<16x32xf32> -> vector<16x32xf32>
    %c1_69 = arith.constant 1 : index
    %c0_70 = arith.constant 0 : index
    %c0_71 = arith.constant 0 : index
    %73 = vector.load %arg7[%c1_69, %c0_70, %c0_71] : memref<3x1x32xf32, #tpu.memory_space<vmem>>, vector<1x1x32xf32>
    %74 = vector.shape_cast %73 : vector<1x1x32xf32> to vector<1x32xf32>
    %75 = vector.broadcast %74 : vector<1x32xf32> to vector<16x32xf32>
    %76 = arith.addf %72, %75 : vector<16x32xf32>
    %77 = arith.addf %46, %76 : vector<16x32xf32>
    %78 = arith.mulf %77, %3 : vector<16x32xf32>
    %79 = arith.truncf %78 : vector<16x32xf32> to vector<16x32xbf16>
    %c8_72 = arith.constant 8 : index
    %c0_73 = arith.constant 0 : index
    %80 = vector.load %arg11[%c8_72, %c0_73] : memref<32x32xbf16, #tpu.memory_space<vmem>>, vector<16x32xbf16>
    tpu.vector_store %arg11[%c8_72, %c0_73], %79 {strides = array<i32>} : memref<32x32xbf16, #tpu.memory_space<vmem>>, vector<16x32xbf16>,
    %c2_74 = arith.constant 2 : index
    %c0_75 = arith.constant 0 : index
    %c0_76 = arith.constant 0 : index
    %81 = vector.load %arg5[%c2_74, %c0_75, %c0_76] : memref<3x1x32xf32, #tpu.memory_space<vmem>>, vector<1x1x32xf32>
    %82 = vector.shape_cast %81 : vector<1x1x32xf32> to vector<1x32xf32>
    %c4 = arith.constant 4 : index
    %c0_77 = arith.constant 0 : index
    %83 = vector.load %arg11[%c4, %c0_77] : memref<32x32xbf16, #tpu.memory_space<vmem>>, vector<16x32xbf16>
    %c2_78 = arith.constant 2 : index
    %c0_79 = arith.constant 0 : index
    %c0_80 = arith.constant 0 : index
    %c0_81 = arith.constant 0 : index
    %84 = vector.load %arg4[%c2_78, %c0_79, %c0_80, %c0_81] : memref<3x3x32x32xbf16, #tpu.memory_space<vmem>>, vector<1x1x32x32xbf16>
    %85 = vector.shape_cast %84 : vector<1x1x32x32xbf16> to vector<32x32xbf16>
    %cst_82 = arith.constant dense<0.000000e+00> : vector<16x32xf32>
    %86 = tpu.matmul %83, %85, %cst_82 {dimension_numbers = #tpu.dot_dimension_numbers<[1], [0], [0], [1], [0, 0, 1, 1], [], []>} : vector<16x32xbf16>, vector<32x32xbf16>, vector<16x32xf32> -> vector<16x32xf32>
    %87 = vector.broadcast %82 : vector<1x32xf32> to vector<16x32xf32>
    %88 = arith.addf %87, %86 : vector<16x32xf32>
    %c8_83 = arith.constant 8 : index
    %c0_84 = arith.constant 0 : index
    %89 = vector.load %arg11[%c8_83, %c0_84] : memref<32x32xbf16, #tpu.memory_space<vmem>>, vector<16x32xbf16>
    %c2_85 = arith.constant 2 : index
    %c1_86 = arith.constant 1 : index
    %c0_87 = arith.constant 0 : index
    %c0_88 = arith.constant 0 : index
    %90 = vector.load %arg4[%c2_85, %c1_86, %c0_87, %c0_88] : memref<3x3x32x32xbf16, #tpu.memory_space<vmem>>, vector<1x1x32x32xbf16>
    %91 = vector.shape_cast %90 : vector<1x1x32x32xbf16> to vector<32x32xbf16>
    %cst_89 = arith.constant dense<0.000000e+00> : vector<16x32xf32>
    %92 = tpu.matmul %89, %91, %cst_89 {dimension_numbers = #tpu.dot_dimension_numbers<[1], [0], [0], [1], [0, 0, 1, 1], [], []>} : vector<16x32xbf16>, vector<32x32xbf16>, vector<16x32xf32> -> vector<16x32xf32>
    %93 = arith.addf %88, %92 : vector<16x32xf32>
    %c12 = arith.constant 12 : index
    %c0_90 = arith.constant 0 : index
    %94 = vector.load %arg11[%c12, %c0_90] : memref<32x32xbf16, #tpu.memory_space<vmem>>, vector<16x32xbf16>
    %c2_91 = arith.constant 2 : index
    %c2_92 = arith.constant 2 : index
    %c0_93 = arith.constant 0 : index
    %c0_94 = arith.constant 0 : index
    %95 = vector.load %arg4[%c2_91, %c2_92, %c0_93, %c0_94] : memref<3x3x32x32xbf16, #tpu.memory_space<vmem>>, vector<1x1x32x32xbf16>
    %96 = vector.shape_cast %95 : vector<1x1x32x32xbf16> to vector<32x32xbf16>
    %cst_95 = arith.constant dense<0.000000e+00> : vector<16x32xf32>
    %97 = tpu.matmul %94, %96, %cst_95 {dimension_numbers = #tpu.dot_dimension_numbers<[1], [0], [0], [1], [0, 0, 1, 1], [], []>} : vector<16x32xbf16>, vector<32x32xbf16>, vector<16x32xf32> -> vector<16x32xf32>
    %98 = arith.addf %93, %97 : vector<16x32xf32>
    %cst_96 = arith.constant 0.000000e+00 : f32
    %99 = vector.broadcast %cst_96 : f32 to vector<16x32xf32>
    %100 = arith.maximumf %98, %99 : vector<16x32xf32>
    %c2_97 = arith.constant 2 : index
    %c0_98 = arith.constant 0 : index
    %c0_99 = arith.constant 0 : index
    %101 = vector.load %arg6[%c2_97, %c0_98, %c0_99] : memref<3x32x32xbf16, #tpu.memory_space<vmem>>, vector<1x32x32xbf16>
    %102 = vector.shape_cast %101 : vector<1x32x32xbf16> to vector<32x32xbf16>
    %103 = arith.truncf %100 : vector<16x32xf32> to vector<16x32xbf16>
    %cst_100 = arith.constant dense<0.000000e+00> : vector<16x32xf32>
    %104 = tpu.matmul %103, %102, %cst_100 {dimension_numbers = #tpu.dot_dimension_numbers<[1], [0], [0], [1], [0, 0, 1, 1], [], []>} : vector<16x32xbf16>, vector<32x32xbf16>, vector<16x32xf32> -> vector<16x32xf32>
    %c2_101 = arith.constant 2 : index
    %c0_102 = arith.constant 0 : index
    %c0_103 = arith.constant 0 : index
    %105 = vector.load %arg7[%c2_101, %c0_102, %c0_103] : memref<3x1x32xf32, #tpu.memory_space<vmem>>, vector<1x1x32xf32>
    %106 = vector.shape_cast %105 : vector<1x1x32xf32> to vector<1x32xf32>
    %107 = vector.broadcast %106 : vector<1x32xf32> to vector<16x32xf32>
    %108 = arith.addf %104, %107 : vector<16x32xf32>
    %109 = arith.addf %78, %108 : vector<16x32xf32>
    %110 = arith.mulf %109, %3 : vector<16x32xf32>
    %111 = arith.truncf %110 : vector<16x32xf32> to vector<16x32xbf16>
    %c8_104 = arith.constant 8 : index
    %c0_105 = arith.constant 0 : index
    %112 = vector.load %arg11[%c8_104, %c0_105] : memref<32x32xbf16, #tpu.memory_space<vmem>>, vector<16x32xbf16>
    tpu.vector_store %arg11[%c8_104, %c0_105], %111 {strides = array<i32>} : memref<32x32xbf16, #tpu.memory_space<vmem>>, vector<16x32xbf16>,
    %c0_106 = arith.constant 0 : index
    %c0_107 = arith.constant 0 : index
    %113 = vector.load %arg8[%c0_106, %c0_107] : memref<32x96xbf16, #tpu.memory_space<vmem>>, vector<32x96xbf16>
    %114 = arith.truncf %110 : vector<16x32xf32> to vector<16x32xbf16>
    %cst_108 = arith.constant dense<0.000000e+00> : vector<16x96xf32>
    %115 = tpu.matmul %114, %113, %cst_108 {dimension_numbers = #tpu.dot_dimension_numbers<[1], [0], [0], [1], [0, 0, 1, 1], [], []>} : vector<16x32xbf16>, vector<32x96xbf16>, vector<16x96xf32> -> vector<16x96xf32>
    %c0_109 = arith.constant 0 : index
    %c0_110 = arith.constant 0 : index
    %116 = vector.load %arg9[%c0_109, %c0_110] : memref<1x96xf32, #tpu.memory_space<vmem>>, vector<1x96xf32>
    %117 = vector.broadcast %116 : vector<1x96xf32> to vector<16x96xf32>
    %118 = arith.addf %115, %117 : vector<16x96xf32>
    %119 = tpu.concatenate %110, %118 in 1 : vector<16x32xf32>, vector<16x96xf32> -> vector<16x128xf32>
    %120 = vector.broadcast %1 : vector<16x1xf32> to vector<16x128xf32>
    %121 = arith.mulf %119, %120 : vector<16x128xf32>
    %c0_111 = arith.constant 0 : index
    %c0_112 = arith.constant 0 : index
    %c0_113 = arith.constant 0 : index
    %122 = vector.load %arg10[%c0_111, %c0_112, %c0_113] : memref<1x16x128xf32, #tpu.memory_space<vmem>>, vector<1x16x128xf32>
    %123 = vector.shape_cast %122 : vector<1x16x128xf32> to vector<16x128xf32>
    %124 = vector.shape_cast %121 : vector<16x128xf32> to vector<1x16x128xf32>
    tpu.vector_store %arg10[%c0_111, %c0_112, %c0_113], %124 {strides = array<i32>} : memref<1x16x128xf32, #tpu.memory_space<vmem>>, vector<1x16x128xf32>,
    return
  }
  func.func @transform_0(%arg0: i32) -> (i32, i32, i32) {
    %c0_i32 = arith.constant 0 : i32
    %c0_i32_0 = arith.constant 0 : i32
    %c0_i32_1 = arith.constant 0 : i32
    return %arg0, %c0_i32, %c0_i32_0 : i32, i32, i32
  }
  func.func @transform_1(%arg0: i32) -> (i32, i32, i32) {
    %c0_i32 = arith.constant 0 : i32
    %c0_i32_0 = arith.constant 0 : i32
    %c0_i32_1 = arith.constant 0 : i32
    return %arg0, %c0_i32, %c0_i32_0 : i32, i32, i32
  }
  func.func @transform_2(%arg0: i32) -> (i32, i32) {
    %c0_i32 = arith.constant 0 : i32
    %c0_i32_0 = arith.constant 0 : i32
    %c0_i32_1 = arith.constant 0 : i32
    return %c0_i32, %c0_i32_0 : i32, i32
  }
  func.func @transform_3(%arg0: i32) -> (i32, i32, i32, i32) {
    %c0_i32 = arith.constant 0 : i32
    %c0_i32_0 = arith.constant 0 : i32
    %c0_i32_1 = arith.constant 0 : i32
    %c0_i32_2 = arith.constant 0 : i32
    %c0_i32_3 = arith.constant 0 : i32
    return %c0_i32, %c0_i32_0, %c0_i32_1, %c0_i32_2 : i32, i32, i32, i32
  }
  func.func @transform_4(%arg0: i32) -> (i32, i32, i32) {
    %c0_i32 = arith.constant 0 : i32
    %c0_i32_0 = arith.constant 0 : i32
    %c0_i32_1 = arith.constant 0 : i32
    %c0_i32_2 = arith.constant 0 : i32
    return %c0_i32, %c0_i32_0, %c0_i32_1 : i32, i32, i32
  }
  func.func @transform_5(%arg0: i32) -> (i32, i32, i32) {
    %c0_i32 = arith.constant 0 : i32
    %c0_i32_0 = arith.constant 0 : i32
    %c0_i32_1 = arith.constant 0 : i32
    %c0_i32_2 = arith.constant 0 : i32
    return %c0_i32, %c0_i32_0, %c0_i32_1 : i32, i32, i32
  }
  func.func @transform_6(%arg0: i32) -> (i32, i32, i32) {
    %c0_i32 = arith.constant 0 : i32
    %c0_i32_0 = arith.constant 0 : i32
    %c0_i32_1 = arith.constant 0 : i32
    %c0_i32_2 = arith.constant 0 : i32
    return %c0_i32, %c0_i32_0, %c0_i32_1 : i32, i32, i32
  }
  func.func @transform_7(%arg0: i32) -> (i32, i32) {
    %c0_i32 = arith.constant 0 : i32
    %c0_i32_0 = arith.constant 0 : i32
    %c0_i32_1 = arith.constant 0 : i32
    return %c0_i32, %c0_i32_0 : i32, i32
  }
  func.func @transform_8(%arg0: i32) -> (i32, i32) {
    %c0_i32 = arith.constant 0 : i32
    %c0_i32_0 = arith.constant 0 : i32
    %c0_i32_1 = arith.constant 0 : i32
    return %c0_i32, %c0_i32_0 : i32, i32
  }
  func.func @transform_9(%arg0: i32) -> (i32, i32, i32) {
    %c0_i32 = arith.constant 0 : i32
    %c0_i32_0 = arith.constant 0 : i32
    %c0_i32_1 = arith.constant 0 : i32
    return %arg0, %c0_i32, %c0_i32_0 : i32, i32, i32
  }
}

module attributes {stable_mosaic.version = 11 : i64} {
  func.func @kernel(%arg0: i32, %arg1: memref<1x16x128xf32, #tpu.memory_space<vmem>>, %arg2: memref<1x16x1xf32, #tpu.memory_space<vmem>>, %arg3: memref<6x32xbf16, #tpu.memory_space<vmem>>, %arg4: memref<1x32xf32, #tpu.memory_space<vmem>>, %arg5: memref<3x3x32x32xbf16, #tpu.memory_space<vmem>>, %arg6: memref<3x1x32xf32, #tpu.memory_space<vmem>>, %arg7: memref<3x32x32xbf16, #tpu.memory_space<vmem>>, %arg8: memref<3x1x32xf32, #tpu.memory_space<vmem>>, %arg9: memref<32x96xbf16, #tpu.memory_space<vmem>>, %arg10: memref<1x96xf32, #tpu.memory_space<vmem>>, %arg11: memref<1x16x128xf32, #tpu.memory_space<vmem>>, %arg12: memref<32x32xbf16, #tpu.memory_space<vmem>>) attributes {dimension_semantics = [#tpu.dimension_semantics<parallel>], iteration_bounds = array<i64: 2>, scalar_prefetch = 0 : i64, scratch_operands = 1 : i64, tpu.core_type = #tpu.core_type<tc>, window_params = [{transform_indices = @transform_0, window_bounds = array<i64: 1, 16, 128>}, {transform_indices = @transform_1, window_bounds = array<i64: 1, 16, 1>}, {pipeline_mode = #tpu.pipeline_mode<synchronous>, transform_indices = @transform_2, window_bounds = array<i64: 6, 32>}, {pipeline_mode = #tpu.pipeline_mode<synchronous>, transform_indices = @transform_3, window_bounds = array<i64: 1, 32>}, {pipeline_mode = #tpu.pipeline_mode<synchronous>, transform_indices = @transform_4, window_bounds = array<i64: 3, 3, 32, 32>}, {pipeline_mode = #tpu.pipeline_mode<synchronous>, transform_indices = @transform_5, window_bounds = array<i64: 3, 1, 32>}, {pipeline_mode = #tpu.pipeline_mode<synchronous>, transform_indices = @transform_6, window_bounds = array<i64: 3, 32, 32>}, {pipeline_mode = #tpu.pipeline_mode<synchronous>, transform_indices = @transform_7, window_bounds = array<i64: 3, 1, 32>}, {pipeline_mode = #tpu.pipeline_mode<synchronous>, transform_indices = @transform_8, window_bounds = array<i64: 32, 96>}, {pipeline_mode = #tpu.pipeline_mode<synchronous>, transform_indices = @transform_9, window_bounds = array<i64: 1, 96>}, {transform_indices = @transform_10, window_bounds = array<i64: 1, 16, 128>}]} {
    %c0 = arith.constant 0 : index
    %c0_0 = arith.constant 0 : index
    %c0_1 = arith.constant 0 : index
    %0 = vector.load %arg2[%c0, %c0_0, %c0_1] : memref<1x16x1xf32, #tpu.memory_space<vmem>>, vector<1x16x1xf32>
    %1 = vector.shape_cast %0 : vector<1x16x1xf32> to vector<16x1xf32>
    %2 = vector.shape_cast %1 : vector<16x1xf32> to vector<16x1xf32>
    %3 = vector.broadcast %2 : vector<16x1xf32> to vector<16x32xf32>
    %cst = arith.constant 0.000000e+00 : bf16
    %4 = vector.broadcast %cst : bf16 to vector<8x32xbf16>
    %c0_2 = arith.constant 0 : index
    %c0_3 = arith.constant 0 : index
    %5 = vector.load %arg12[%c0_2, %c0_3] : memref<32x32xbf16, #tpu.memory_space<vmem>>, vector<8x32xbf16>
    tpu.vector_store %arg12[%c0_2, %c0_3], %4 {strides = array<i32>} : memref<32x32xbf16, #tpu.memory_space<vmem>>, vector<8x32xbf16>,
    %cst_4 = arith.constant 0.000000e+00 : bf16
    %6 = vector.broadcast %cst_4 : bf16 to vector<8x32xbf16>
    %c24 = arith.constant 24 : index
    %c0_5 = arith.constant 0 : index
    %7 = vector.load %arg12[%c24, %c0_5] : memref<32x32xbf16, #tpu.memory_space<vmem>>, vector<8x32xbf16>
    tpu.vector_store %arg12[%c24, %c0_5], %6 {strides = array<i32>} : memref<32x32xbf16, #tpu.memory_space<vmem>>, vector<8x32xbf16>,
    %c0_6 = arith.constant 0 : index
    %c0_7 = arith.constant 0 : index
    %c0_8 = arith.constant 0 : index
    %8 = vector.load %arg1[%c0_6, %c0_7, %c0_8] : memref<1x16x128xf32, #tpu.memory_space<vmem>>, vector<1x16x128xf32>
    %9 = vector.shape_cast %8 : vector<1x16x128xf32> to vector<16x128xf32>
    %10 = vector.extract_strided_slice %9 {offsets = [0, 32], sizes = [16, 6], strides = [1, 1]} : vector<16x128xf32> to vector<16x6xf32>
    %cst_9 = arith.constant dense<0xFF800000> : vector<16xf32>
    %11 = vector.multi_reduction <maximumf>, %10, %cst_9 [1] : vector<16x6xf32> to vector<16xf32>
    %12 = vector.shape_cast %11 : vector<16xf32> to vector<16x1xf32>
    %13 = vector.broadcast %12 : vector<16x1xf32> to vector<16x6xf32>
    %14 = arith.subf %10, %13 : vector<16x6xf32>
    %15 = math.exp %14 : vector<16x6xf32>
    %cst_10 = arith.constant dense<0.000000e+00> : vector<16xf32>
    %16 = vector.multi_reduction <add>, %15, %cst_10 [1] : vector<16x6xf32> to vector<16xf32>
    %17 = vector.shape_cast %16 : vector<16xf32> to vector<16x1xf32>
    %18 = vector.broadcast %17 : vector<16x1xf32> to vector<16x6xf32>
    %19 = arith.divf %15, %18 : vector<16x6xf32>
    %20 = vector.broadcast %1 : vector<16x1xf32> to vector<16x6xf32>
    %21 = arith.mulf %19, %20 : vector<16x6xf32>
    %c0_11 = arith.constant 0 : index
    %c0_12 = arith.constant 0 : index
    %22 = vector.load %arg3[%c0_11, %c0_12] : memref<6x32xbf16, #tpu.memory_space<vmem>>, vector<6x32xbf16>
    %23 = arith.truncf %21 : vector<16x6xf32> to vector<16x6xbf16>
    %cst_13 = arith.constant dense<0.000000e+00> : vector<16x32xf32>
    %24 = tpu.matmul %23, %22, %cst_13 {dimension_numbers = #tpu.dot_dimension_numbers<[1], [0], [0], [1], [0, 0, 1, 1], [], []>} : vector<16x6xbf16>, vector<6x32xbf16>, vector<16x32xf32> -> vector<16x32xf32>
    %c0_14 = arith.constant 0 : index
    %c0_15 = arith.constant 0 : index
    %25 = vector.load %arg4[%c0_14, %c0_15] : memref<1x32xf32, #tpu.memory_space<vmem>>, vector<1x32xf32>
    %26 = vector.broadcast %25 : vector<1x32xf32> to vector<16x32xf32>
    %27 = arith.addf %24, %26 : vector<16x32xf32>
    %28 = arith.mulf %27, %3 : vector<16x32xf32>
    %29 = arith.truncf %28 : vector<16x32xf32> to vector<16x32xbf16>
    %c8 = arith.constant 8 : index
    %c0_16 = arith.constant 0 : index
    %30 = vector.load %arg12[%c8, %c0_16] : memref<32x32xbf16, #tpu.memory_space<vmem>>, vector<16x32xbf16>
    tpu.vector_store %arg12[%c8, %c0_16], %29 {strides = array<i32>} : memref<32x32xbf16, #tpu.memory_space<vmem>>, vector<16x32xbf16>,
    %c0_17 = arith.constant 0 : index
    %c0_18 = arith.constant 0 : index
    %c0_19 = arith.constant 0 : index
    %31 = vector.load %arg6[%c0_17, %c0_18, %c0_19] : memref<3x1x32xf32, #tpu.memory_space<vmem>>, vector<1x1x32xf32>
    %32 = vector.shape_cast %31 : vector<1x1x32xf32> to vector<1x32xf32>
    %c7 = arith.constant 7 : index
    %c0_20 = arith.constant 0 : index
    %33 = vector.load %arg12[%c7, %c0_20] : memref<32x32xbf16, #tpu.memory_space<vmem>>, vector<16x32xbf16>
    %c0_21 = arith.constant 0 : index
    %c0_22 = arith.constant 0 : index
    %c0_23 = arith.constant 0 : index
    %c0_24 = arith.constant 0 : index
    %34 = vector.load %arg5[%c0_21, %c0_22, %c0_23, %c0_24] : memref<3x3x32x32xbf16, #tpu.memory_space<vmem>>, vector<1x1x32x32xbf16>
    %35 = vector.shape_cast %34 : vector<1x1x32x32xbf16> to vector<32x32xbf16>
    %cst_25 = arith.constant dense<0.000000e+00> : vector<16x32xf32>
    %36 = tpu.matmul %33, %35, %cst_25 {dimension_numbers = #tpu.dot_dimension_numbers<[1], [0], [0], [1], [0, 0, 1, 1], [], []>} : vector<16x32xbf16>, vector<32x32xbf16>, vector<16x32xf32> -> vector<16x32xf32>
    %37 = vector.broadcast %32 : vector<1x32xf32> to vector<16x32xf32>
    %38 = arith.addf %37, %36 : vector<16x32xf32>
    %c8_26 = arith.constant 8 : index
    %c0_27 = arith.constant 0 : index
    %39 = vector.load %arg12[%c8_26, %c0_27] : memref<32x32xbf16, #tpu.memory_space<vmem>>, vector<16x32xbf16>
    %c0_28 = arith.constant 0 : index
    %c1 = arith.constant 1 : index
    %c0_29 = arith.constant 0 : index
    %c0_30 = arith.constant 0 : index
    %40 = vector.load %arg5[%c0_28, %c1, %c0_29, %c0_30] : memref<3x3x32x32xbf16, #tpu.memory_space<vmem>>, vector<1x1x32x32xbf16>
    %41 = vector.shape_cast %40 : vector<1x1x32x32xbf16> to vector<32x32xbf16>
    %cst_31 = arith.constant dense<0.000000e+00> : vector<16x32xf32>
    %42 = tpu.matmul %39, %41, %cst_31 {dimension_numbers = #tpu.dot_dimension_numbers<[1], [0], [0], [1], [0, 0, 1, 1], [], []>} : vector<16x32xbf16>, vector<32x32xbf16>, vector<16x32xf32> -> vector<16x32xf32>
    %43 = arith.addf %38, %42 : vector<16x32xf32>
    %c9 = arith.constant 9 : index
    %c0_32 = arith.constant 0 : index
    %44 = vector.load %arg12[%c9, %c0_32] : memref<32x32xbf16, #tpu.memory_space<vmem>>, vector<16x32xbf16>
    %c0_33 = arith.constant 0 : index
    %c2 = arith.constant 2 : index
    %c0_34 = arith.constant 0 : index
    %c0_35 = arith.constant 0 : index
    %45 = vector.load %arg5[%c0_33, %c2, %c0_34, %c0_35] : memref<3x3x32x32xbf16, #tpu.memory_space<vmem>>, vector<1x1x32x32xbf16>
    %46 = vector.shape_cast %45 : vector<1x1x32x32xbf16> to vector<32x32xbf16>
    %cst_36 = arith.constant dense<0.000000e+00> : vector<16x32xf32>
    %47 = tpu.matmul %44, %46, %cst_36 {dimension_numbers = #tpu.dot_dimension_numbers<[1], [0], [0], [1], [0, 0, 1, 1], [], []>} : vector<16x32xbf16>, vector<32x32xbf16>, vector<16x32xf32> -> vector<16x32xf32>
    %48 = arith.addf %43, %47 : vector<16x32xf32>
    %cst_37 = arith.constant 0.000000e+00 : f32
    %49 = vector.broadcast %cst_37 : f32 to vector<16x32xf32>
    %50 = arith.maximumf %48, %49 : vector<16x32xf32>
    %c0_38 = arith.constant 0 : index
    %c0_39 = arith.constant 0 : index
    %c0_40 = arith.constant 0 : index
    %51 = vector.load %arg7[%c0_38, %c0_39, %c0_40] : memref<3x32x32xbf16, #tpu.memory_space<vmem>>, vector<1x32x32xbf16>
    %52 = vector.shape_cast %51 : vector<1x32x32xbf16> to vector<32x32xbf16>
    %53 = arith.truncf %50 : vector<16x32xf32> to vector<16x32xbf16>
    %cst_41 = arith.constant dense<0.000000e+00> : vector<16x32xf32>
    %54 = tpu.matmul %53, %52, %cst_41 {dimension_numbers = #tpu.dot_dimension_numbers<[1], [0], [0], [1], [0, 0, 1, 1], [], []>} : vector<16x32xbf16>, vector<32x32xbf16>, vector<16x32xf32> -> vector<16x32xf32>
    %c0_42 = arith.constant 0 : index
    %c0_43 = arith.constant 0 : index
    %c0_44 = arith.constant 0 : index
    %55 = vector.load %arg8[%c0_42, %c0_43, %c0_44] : memref<3x1x32xf32, #tpu.memory_space<vmem>>, vector<1x1x32xf32>
    %56 = vector.shape_cast %55 : vector<1x1x32xf32> to vector<1x32xf32>
    %57 = vector.broadcast %56 : vector<1x32xf32> to vector<16x32xf32>
    %58 = arith.addf %54, %57 : vector<16x32xf32>
    %59 = arith.addf %28, %58 : vector<16x32xf32>
    %60 = arith.mulf %59, %3 : vector<16x32xf32>
    %61 = arith.truncf %60 : vector<16x32xf32> to vector<16x32xbf16>
    %c8_45 = arith.constant 8 : index
    %c0_46 = arith.constant 0 : index
    %62 = vector.load %arg12[%c8_45, %c0_46] : memref<32x32xbf16, #tpu.memory_space<vmem>>, vector<16x32xbf16>
    tpu.vector_store %arg12[%c8_45, %c0_46], %61 {strides = array<i32>} : memref<32x32xbf16, #tpu.memory_space<vmem>>, vector<16x32xbf16>,
    %c1_47 = arith.constant 1 : index
    %c0_48 = arith.constant 0 : index
    %c0_49 = arith.constant 0 : index
    %63 = vector.load %arg6[%c1_47, %c0_48, %c0_49] : memref<3x1x32xf32, #tpu.memory_space<vmem>>, vector<1x1x32xf32>
    %64 = vector.shape_cast %63 : vector<1x1x32xf32> to vector<1x32xf32>
    %c6 = arith.constant 6 : index
    %c0_50 = arith.constant 0 : index
    %65 = vector.load %arg12[%c6, %c0_50] : memref<32x32xbf16, #tpu.memory_space<vmem>>, vector<16x32xbf16>
    %c1_51 = arith.constant 1 : index
    %c0_52 = arith.constant 0 : index
    %c0_53 = arith.constant 0 : index
    %c0_54 = arith.constant 0 : index
    %66 = vector.load %arg5[%c1_51, %c0_52, %c0_53, %c0_54] : memref<3x3x32x32xbf16, #tpu.memory_space<vmem>>, vector<1x1x32x32xbf16>
    %67 = vector.shape_cast %66 : vector<1x1x32x32xbf16> to vector<32x32xbf16>
    %cst_55 = arith.constant dense<0.000000e+00> : vector<16x32xf32>
    %68 = tpu.matmul %65, %67, %cst_55 {dimension_numbers = #tpu.dot_dimension_numbers<[1], [0], [0], [1], [0, 0, 1, 1], [], []>} : vector<16x32xbf16>, vector<32x32xbf16>, vector<16x32xf32> -> vector<16x32xf32>
    %69 = vector.broadcast %64 : vector<1x32xf32> to vector<16x32xf32>
    %70 = arith.addf %69, %68 : vector<16x32xf32>
    %c8_56 = arith.constant 8 : index
    %c0_57 = arith.constant 0 : index
    %71 = vector.load %arg12[%c8_56, %c0_57] : memref<32x32xbf16, #tpu.memory_space<vmem>>, vector<16x32xbf16>
    %c1_58 = arith.constant 1 : index
    %c1_59 = arith.constant 1 : index
    %c0_60 = arith.constant 0 : index
    %c0_61 = arith.constant 0 : index
    %72 = vector.load %arg5[%c1_58, %c1_59, %c0_60, %c0_61] : memref<3x3x32x32xbf16, #tpu.memory_space<vmem>>, vector<1x1x32x32xbf16>
    %73 = vector.shape_cast %72 : vector<1x1x32x32xbf16> to vector<32x32xbf16>
    %cst_62 = arith.constant dense<0.000000e+00> : vector<16x32xf32>
    %74 = tpu.matmul %71, %73, %cst_62 {dimension_numbers = #tpu.dot_dimension_numbers<[1], [0], [0], [1], [0, 0, 1, 1], [], []>} : vector<16x32xbf16>, vector<32x32xbf16>, vector<16x32xf32> -> vector<16x32xf32>
    %75 = arith.addf %70, %74 : vector<16x32xf32>
    %c10 = arith.constant 10 : index
    %c0_63 = arith.constant 0 : index
    %76 = vector.load %arg12[%c10, %c0_63] : memref<32x32xbf16, #tpu.memory_space<vmem>>, vector<16x32xbf16>
    %c1_64 = arith.constant 1 : index
    %c2_65 = arith.constant 2 : index
    %c0_66 = arith.constant 0 : index
    %c0_67 = arith.constant 0 : index
    %77 = vector.load %arg5[%c1_64, %c2_65, %c0_66, %c0_67] : memref<3x3x32x32xbf16, #tpu.memory_space<vmem>>, vector<1x1x32x32xbf16>
    %78 = vector.shape_cast %77 : vector<1x1x32x32xbf16> to vector<32x32xbf16>
    %cst_68 = arith.constant dense<0.000000e+00> : vector<16x32xf32>
    %79 = tpu.matmul %76, %78, %cst_68 {dimension_numbers = #tpu.dot_dimension_numbers<[1], [0], [0], [1], [0, 0, 1, 1], [], []>} : vector<16x32xbf16>, vector<32x32xbf16>, vector<16x32xf32> -> vector<16x32xf32>
    %80 = arith.addf %75, %79 : vector<16x32xf32>
    %cst_69 = arith.constant 0.000000e+00 : f32
    %81 = vector.broadcast %cst_69 : f32 to vector<16x32xf32>
    %82 = arith.maximumf %80, %81 : vector<16x32xf32>
    %c1_70 = arith.constant 1 : index
    %c0_71 = arith.constant 0 : index
    %c0_72 = arith.constant 0 : index
    %83 = vector.load %arg7[%c1_70, %c0_71, %c0_72] : memref<3x32x32xbf16, #tpu.memory_space<vmem>>, vector<1x32x32xbf16>
    %84 = vector.shape_cast %83 : vector<1x32x32xbf16> to vector<32x32xbf16>
    %85 = arith.truncf %82 : vector<16x32xf32> to vector<16x32xbf16>
    %cst_73 = arith.constant dense<0.000000e+00> : vector<16x32xf32>
    %86 = tpu.matmul %85, %84, %cst_73 {dimension_numbers = #tpu.dot_dimension_numbers<[1], [0], [0], [1], [0, 0, 1, 1], [], []>} : vector<16x32xbf16>, vector<32x32xbf16>, vector<16x32xf32> -> vector<16x32xf32>
    %c1_74 = arith.constant 1 : index
    %c0_75 = arith.constant 0 : index
    %c0_76 = arith.constant 0 : index
    %87 = vector.load %arg8[%c1_74, %c0_75, %c0_76] : memref<3x1x32xf32, #tpu.memory_space<vmem>>, vector<1x1x32xf32>
    %88 = vector.shape_cast %87 : vector<1x1x32xf32> to vector<1x32xf32>
    %89 = vector.broadcast %88 : vector<1x32xf32> to vector<16x32xf32>
    %90 = arith.addf %86, %89 : vector<16x32xf32>
    %91 = arith.addf %60, %90 : vector<16x32xf32>
    %92 = arith.mulf %91, %3 : vector<16x32xf32>
    %93 = arith.truncf %92 : vector<16x32xf32> to vector<16x32xbf16>
    %c8_77 = arith.constant 8 : index
    %c0_78 = arith.constant 0 : index
    %94 = vector.load %arg12[%c8_77, %c0_78] : memref<32x32xbf16, #tpu.memory_space<vmem>>, vector<16x32xbf16>
    tpu.vector_store %arg12[%c8_77, %c0_78], %93 {strides = array<i32>} : memref<32x32xbf16, #tpu.memory_space<vmem>>, vector<16x32xbf16>,
    %c2_79 = arith.constant 2 : index
    %c0_80 = arith.constant 0 : index
    %c0_81 = arith.constant 0 : index
    %95 = vector.load %arg6[%c2_79, %c0_80, %c0_81] : memref<3x1x32xf32, #tpu.memory_space<vmem>>, vector<1x1x32xf32>
    %96 = vector.shape_cast %95 : vector<1x1x32xf32> to vector<1x32xf32>
    %c4 = arith.constant 4 : index
    %c0_82 = arith.constant 0 : index
    %97 = vector.load %arg12[%c4, %c0_82] : memref<32x32xbf16, #tpu.memory_space<vmem>>, vector<16x32xbf16>
    %c2_83 = arith.constant 2 : index
    %c0_84 = arith.constant 0 : index
    %c0_85 = arith.constant 0 : index
    %c0_86 = arith.constant 0 : index
    %98 = vector.load %arg5[%c2_83, %c0_84, %c0_85, %c0_86] : memref<3x3x32x32xbf16, #tpu.memory_space<vmem>>, vector<1x1x32x32xbf16>
    %99 = vector.shape_cast %98 : vector<1x1x32x32xbf16> to vector<32x32xbf16>
    %cst_87 = arith.constant dense<0.000000e+00> : vector<16x32xf32>
    %100 = tpu.matmul %97, %99, %cst_87 {dimension_numbers = #tpu.dot_dimension_numbers<[1], [0], [0], [1], [0, 0, 1, 1], [], []>} : vector<16x32xbf16>, vector<32x32xbf16>, vector<16x32xf32> -> vector<16x32xf32>
    %101 = vector.broadcast %96 : vector<1x32xf32> to vector<16x32xf32>
    %102 = arith.addf %101, %100 : vector<16x32xf32>
    %c8_88 = arith.constant 8 : index
    %c0_89 = arith.constant 0 : index
    %103 = vector.load %arg12[%c8_88, %c0_89] : memref<32x32xbf16, #tpu.memory_space<vmem>>, vector<16x32xbf16>
    %c2_90 = arith.constant 2 : index
    %c1_91 = arith.constant 1 : index
    %c0_92 = arith.constant 0 : index
    %c0_93 = arith.constant 0 : index
    %104 = vector.load %arg5[%c2_90, %c1_91, %c0_92, %c0_93] : memref<3x3x32x32xbf16, #tpu.memory_space<vmem>>, vector<1x1x32x32xbf16>
    %105 = vector.shape_cast %104 : vector<1x1x32x32xbf16> to vector<32x32xbf16>
    %cst_94 = arith.constant dense<0.000000e+00> : vector<16x32xf32>
    %106 = tpu.matmul %103, %105, %cst_94 {dimension_numbers = #tpu.dot_dimension_numbers<[1], [0], [0], [1], [0, 0, 1, 1], [], []>} : vector<16x32xbf16>, vector<32x32xbf16>, vector<16x32xf32> -> vector<16x32xf32>
    %107 = arith.addf %102, %106 : vector<16x32xf32>
    %c12 = arith.constant 12 : index
    %c0_95 = arith.constant 0 : index
    %108 = vector.load %arg12[%c12, %c0_95] : memref<32x32xbf16, #tpu.memory_space<vmem>>, vector<16x32xbf16>
    %c2_96 = arith.constant 2 : index
    %c2_97 = arith.constant 2 : index
    %c0_98 = arith.constant 0 : index
    %c0_99 = arith.constant 0 : index
    %109 = vector.load %arg5[%c2_96, %c2_97, %c0_98, %c0_99] : memref<3x3x32x32xbf16, #tpu.memory_space<vmem>>, vector<1x1x32x32xbf16>
    %110 = vector.shape_cast %109 : vector<1x1x32x32xbf16> to vector<32x32xbf16>
    %cst_100 = arith.constant dense<0.000000e+00> : vector<16x32xf32>
    %111 = tpu.matmul %108, %110, %cst_100 {dimension_numbers = #tpu.dot_dimension_numbers<[1], [0], [0], [1], [0, 0, 1, 1], [], []>} : vector<16x32xbf16>, vector<32x32xbf16>, vector<16x32xf32> -> vector<16x32xf32>
    %112 = arith.addf %107, %111 : vector<16x32xf32>
    %cst_101 = arith.constant 0.000000e+00 : f32
    %113 = vector.broadcast %cst_101 : f32 to vector<16x32xf32>
    %114 = arith.maximumf %112, %113 : vector<16x32xf32>
    %c2_102 = arith.constant 2 : index
    %c0_103 = arith.constant 0 : index
    %c0_104 = arith.constant 0 : index
    %115 = vector.load %arg7[%c2_102, %c0_103, %c0_104] : memref<3x32x32xbf16, #tpu.memory_space<vmem>>, vector<1x32x32xbf16>
    %116 = vector.shape_cast %115 : vector<1x32x32xbf16> to vector<32x32xbf16>
    %117 = arith.truncf %114 : vector<16x32xf32> to vector<16x32xbf16>
    %cst_105 = arith.constant dense<0.000000e+00> : vector<16x32xf32>
    %118 = tpu.matmul %117, %116, %cst_105 {dimension_numbers = #tpu.dot_dimension_numbers<[1], [0], [0], [1], [0, 0, 1, 1], [], []>} : vector<16x32xbf16>, vector<32x32xbf16>, vector<16x32xf32> -> vector<16x32xf32>
    %c2_106 = arith.constant 2 : index
    %c0_107 = arith.constant 0 : index
    %c0_108 = arith.constant 0 : index
    %119 = vector.load %arg8[%c2_106, %c0_107, %c0_108] : memref<3x1x32xf32, #tpu.memory_space<vmem>>, vector<1x1x32xf32>
    %120 = vector.shape_cast %119 : vector<1x1x32xf32> to vector<1x32xf32>
    %121 = vector.broadcast %120 : vector<1x32xf32> to vector<16x32xf32>
    %122 = arith.addf %118, %121 : vector<16x32xf32>
    %123 = arith.addf %92, %122 : vector<16x32xf32>
    %124 = arith.mulf %123, %3 : vector<16x32xf32>
    %125 = arith.truncf %124 : vector<16x32xf32> to vector<16x32xbf16>
    %c8_109 = arith.constant 8 : index
    %c0_110 = arith.constant 0 : index
    %126 = vector.load %arg12[%c8_109, %c0_110] : memref<32x32xbf16, #tpu.memory_space<vmem>>, vector<16x32xbf16>
    tpu.vector_store %arg12[%c8_109, %c0_110], %125 {strides = array<i32>} : memref<32x32xbf16, #tpu.memory_space<vmem>>, vector<16x32xbf16>,
    %c0_111 = arith.constant 0 : index
    %c0_112 = arith.constant 0 : index
    %127 = vector.load %arg9[%c0_111, %c0_112] : memref<32x96xbf16, #tpu.memory_space<vmem>>, vector<32x96xbf16>
    %128 = arith.truncf %124 : vector<16x32xf32> to vector<16x32xbf16>
    %cst_113 = arith.constant dense<0.000000e+00> : vector<16x96xf32>
    %129 = tpu.matmul %128, %127, %cst_113 {dimension_numbers = #tpu.dot_dimension_numbers<[1], [0], [0], [1], [0, 0, 1, 1], [], []>} : vector<16x32xbf16>, vector<32x96xbf16>, vector<16x96xf32> -> vector<16x96xf32>
    %c0_114 = arith.constant 0 : index
    %c0_115 = arith.constant 0 : index
    %130 = vector.load %arg10[%c0_114, %c0_115] : memref<1x96xf32, #tpu.memory_space<vmem>>, vector<1x96xf32>
    %131 = vector.broadcast %130 : vector<1x96xf32> to vector<16x96xf32>
    %132 = arith.addf %129, %131 : vector<16x96xf32>
    %133 = tpu.concatenate %124, %132 in 1 : vector<16x32xf32>, vector<16x96xf32> -> vector<16x128xf32>
    %134 = vector.broadcast %1 : vector<16x1xf32> to vector<16x128xf32>
    %135 = arith.mulf %133, %134 : vector<16x128xf32>
    %c0_116 = arith.constant 0 : index
    %c0_117 = arith.constant 0 : index
    %c0_118 = arith.constant 0 : index
    %136 = vector.load %arg11[%c0_116, %c0_117, %c0_118] : memref<1x16x128xf32, #tpu.memory_space<vmem>>, vector<1x16x128xf32>
    %137 = vector.shape_cast %136 : vector<1x16x128xf32> to vector<16x128xf32>
    %138 = vector.shape_cast %135 : vector<16x128xf32> to vector<1x16x128xf32>
    tpu.vector_store %arg11[%c0_116, %c0_117, %c0_118], %138 {strides = array<i32>} : memref<1x16x128xf32, #tpu.memory_space<vmem>>, vector<1x16x128xf32>,
    return
  }
  func.func @transform_0(%arg0: i32) -> (i32, i32, i32) {
    %c0_i32 = arith.constant 0 : i32
    %c0_i32_0 = arith.constant 0 : i32
    %c0_i32_1 = arith.constant 0 : i32
    return %arg0, %c0_i32, %c0_i32_0 : i32, i32, i32
  }
  func.func @transform_1(%arg0: i32) -> (i32, i32, i32) {
    %c0_i32 = arith.constant 0 : i32
    %c0_i32_0 = arith.constant 0 : i32
    %c0_i32_1 = arith.constant 0 : i32
    return %arg0, %c0_i32, %c0_i32_0 : i32, i32, i32
  }
  func.func @transform_2(%arg0: i32) -> (i32, i32) {
    %c0_i32 = arith.constant 0 : i32
    %c0_i32_0 = arith.constant 0 : i32
    %c0_i32_1 = arith.constant 0 : i32
    return %c0_i32, %c0_i32_0 : i32, i32
  }
  func.func @transform_3(%arg0: i32) -> (i32, i32) {
    %c0_i32 = arith.constant 0 : i32
    %c0_i32_0 = arith.constant 0 : i32
    %c0_i32_1 = arith.constant 0 : i32
    return %c0_i32, %c0_i32_0 : i32, i32
  }
  func.func @transform_4(%arg0: i32) -> (i32, i32, i32, i32) {
    %c0_i32 = arith.constant 0 : i32
    %c0_i32_0 = arith.constant 0 : i32
    %c0_i32_1 = arith.constant 0 : i32
    %c0_i32_2 = arith.constant 0 : i32
    %c0_i32_3 = arith.constant 0 : i32
    return %c0_i32, %c0_i32_0, %c0_i32_1, %c0_i32_2 : i32, i32, i32, i32
  }
  func.func @transform_5(%arg0: i32) -> (i32, i32, i32) {
    %c0_i32 = arith.constant 0 : i32
    %c0_i32_0 = arith.constant 0 : i32
    %c0_i32_1 = arith.constant 0 : i32
    %c0_i32_2 = arith.constant 0 : i32
    return %c0_i32, %c0_i32_0, %c0_i32_1 : i32, i32, i32
  }
  func.func @transform_6(%arg0: i32) -> (i32, i32, i32) {
    %c0_i32 = arith.constant 0 : i32
    %c0_i32_0 = arith.constant 0 : i32
    %c0_i32_1 = arith.constant 0 : i32
    %c0_i32_2 = arith.constant 0 : i32
    return %c0_i32, %c0_i32_0, %c0_i32_1 : i32, i32, i32
  }
  func.func @transform_7(%arg0: i32) -> (i32, i32, i32) {
    %c0_i32 = arith.constant 0 : i32
    %c0_i32_0 = arith.constant 0 : i32
    %c0_i32_1 = arith.constant 0 : i32
    %c0_i32_2 = arith.constant 0 : i32
    return %c0_i32, %c0_i32_0, %c0_i32_1 : i32, i32, i32
  }
  func.func @transform_8(%arg0: i32) -> (i32, i32) {
    %c0_i32 = arith.constant 0 : i32
    %c0_i32_0 = arith.constant 0 : i32
    %c0_i32_1 = arith.constant 0 : i32
    return %c0_i32, %c0_i32_0 : i32, i32
  }
  func.func @transform_9(%arg0: i32) -> (i32, i32) {
    %c0_i32 = arith.constant 0 : i32
    %c0_i32_0 = arith.constant 0 : i32
    %c0_i32_1 = arith.constant 0 : i32
    return %c0_i32, %c0_i32_0 : i32, i32
  }
  func.func @transform_10(%arg0: i32) -> (i32, i32, i32) {
    %c0_i32 = arith.constant 0 : i32
    %c0_i32_0 = arith.constant 0 : i32
    %c0_i32_1 = arith.constant 0 : i32
    return %arg0, %c0_i32, %c0_i32_0 : i32, i32, i32
  }
}

</mosaic_0001>

<bundles_post_ra>
// kernel: multi_stage_forward.3
= control target key start
LH: loop header
LB: loop body
LE: loop exit
PB: predicated region body
PF: predicated region fallthrough
CT: control target
= control target key end

     0   :  { %s421_s9 = smov 0   ;;  %s423_s10 = smov 0   ;;  %s457_s0 = inlined_call_operand.vmem [shape: bf16[2,16,8], index: 0, kind: input, shape index: {}]   ;;  %s458_s1 = inlined_call_operand.vmem [shape: bf16[8,128], index: 1, kind: input, shape index: {}]   ;;  %s459_s2 = inlined_call_operand.vmem [shape: f32[2,16,128], index: 2, kind: output, shape index: {}]  }
   0x1   :  { %s425_s11 = smov 0  }
   0x2 LB: > { %s24_s12 = sadd.s32 1, %s398_s10  ;;  %p334_p0 = scmp.ge.s32.totalorder %s402_s11, 1  ;;  %s402_s11 = sphi %s425_s11, %s12_s11   ;;  %s398_s10 = sphi %s423_s10, %s461_s10   ;;  %s394_s9 = sphi %s421_s9, %s460_s9  }
   0x3   : > { %p26_p1 = scmp.ge.s32.totalorder %s24_s12, 2  ;;  %p133_p2 = scmp.lt.s32.totalorder %s402_s11, 3 }
   0x5   : > { %s463_s12 = smov (%p26_p1, %s24_s12), 0  ;;  %p134_p3 = pnand %p334_p0, %p133_p2 }
   0x6   : > { %v186_v0 = vld [vmem:[%s458_s1] sm:$0xf] (!%p134_p3)  ;;  %vm196_vm0 = vcmask (!%p134_p3), 1043456   ;;  %p164_p4 = scmp.lt.s32.totalorder (!%p134_p3), %s394_s9, 1  ;;  %v404_v1 = vmov (!%p134_p3), 0.0   ;;  %vm405_vm1 = vmmov (!%p134_p3), 0  }
   0x7   : > { %137 = sbr.rel (%p134_p3) target bundleno = 233 (0xe9), region = 28  ;;  %347 = vmatprep.subr.bf16.mxu0 (!%p134_p3), %v404_v1  ;;  %v198_v2 = vsel (!%p134_p3), %vm196_vm0, %v186_v0, 0  ;;  %349 = vmatprep.mubr.msk.bf16.mxu0 (!%p134_p3), %vm405_vm1, %v404_v1  ;;  %vm192_vm2 = vcmask (!%p134_p3), 64512  }
   0x8   : > { %348 = vmatpush3.bf16.msra.mxu0 (!%p134_p3), %v198_v2 }
   0xe   : > { %s465_s9 = smov (!%p164_p4, %s394_s9), 1 }
   0xf   : > { %s343_s15 = sshll.u32 %s465_s9, 3  ;;  %s344_s19 = sshll.u32 %s465_s9, 4 }
  0x10   : > { %s171_s18 = scalar_lea.vmem %s457_s0, %s343_s15  ;;  %s181_s22 = scalar_lea.vmem %s459_s2, %s344_s19 }
  0x11   : > { %v379_v3 = vld [vmem:[%s171_s18] sm:$0xff]  }
  0x12   : > { %350 = vmatmul.mubr.msk.bf16.vlgmr.msra.gmra.mrb[0].mxu0 %vm192_vm2, %v379_v3 }
  0xe5   : > { %v234_v4 = vpop.f32.mrb[0].mxu0 }
  0xe6   : > { %241 = vst [vmem:[%s181_s22] sm:$0xff] %v234_v4  ;;  %v351_v5 = vpop.f32.mrb[1].mxu0 }
  0xe7   : > { %v237_v6 = vpop.f32.mrb[2].mxu0 }
  0xe8   : > { %242 = vst [vmem:[%s181_s22 + $0x8] sm:$0xff] %v237_v6  ;;  %v352_v7 = vpop.f32.mrb[3].mxu0 }
  0xe9 PF: > { %s12_s11 = sadd.s32 1, %s402_s11   ;;  %s460_s9 = smov %s398_s10 }
  0xea   : > { %p9_p5 = scmp.ge.s32.totalorder %s12_s11, 4   ;;  %s461_s10 = smov %s463_s12 }
  0xec   :  { %11 = sbr.rel (!%p9_p5) target bundleno = 2 (0x2), region = 58 }

// kernel: multi_stage_forward.4
= control target key start
LH: loop header
LB: loop body
LE: loop exit
PB: predicated region body
PF: predicated region fallthrough
CT: control target
= control target key end

     0   :  { %s1844_s30 = smov 0   ;;  %s2089_s0 = inlined_call_operand.vmem [shape: f32[2,16,128], index: 0, kind: input, shape index: {}]   ;;  %s2090_s1 = inlined_call_operand.vmem [shape: f32[2,16,1], index: 1, kind: input, shape index: {}]   ;;  %s2091_s2 = inlined_call_operand.vmem [shape: f32[1,32], index: 2, kind: input, shape index: {}]   ;;  %s2092_s3 = inlined_call_operand.vmem [shape: bf16[3,3,32,32], index: 3, kind: input, shape index: {}]   ;;  %s2093_s4 = inlined_call_operand.vmem [shape: f32[3,1,32], index: 4, kind: input, shape index: {}]   ;;  %s2094_s5 = inlined_call_operand.vmem [shape: bf16[3,32,32], index: 5, kind: input, shape index: {}]   ;;  %s2095_s6 = inlined_call_operand.vmem [shape: f32[3,1,32], index: 6, kind: input, shape index: {}]   ;;  %s2096_s7 = inlined_call_operand.vmem [shape: bf16[32,96], index: 7, kind: input, shape index: {}]   ;;  %s2097_s8 = inlined_call_operand.vmem [shape: f32[1,96], index: 8, kind: input, shape index: {}]   ;;  %s2098_s9 = inlined_call_operand.vmem [shape: f32[2,16,128], index: 9, kind: output, shape index: {}]  }
   0x1 LB: > { %s1463_s10 = sadd.s32 4294967295, %s1788_s30   ;;  %p1467_p0 = scmp.ge.s32.totalorder %s1788_s30, 1  ;;  %s1788_s30 = sphi %s1844_s30, %s19_s30  }
   0x2   : > { %p297_p1 = scmp.lt.s32.totalorder %s1788_s30, 3 }
   0x4   : > { %p298_p2 = pnand %p1467_p0, %p297_p1 }
   0x5   : > { %vm366_vm0 = vcmask (!%p298_p2), 257024   ;;  %vm368_vm1 = vcmask (!%p298_p2), 261124   ;;  %p338_p3 = scmp.lt.s32.totalorder (!%p298_p2), %s1463_s10, 1  ;;  %v1790_v0 = vmov (!%p298_p2), 0   ;;  %v1756_v3 = vld [vmem:[%s2092_s3] sm:$0xff] (!%p298_p2)   ;;  %v1757_v4 = vld [vmem:[%s2092_s3 + $0x8] sm:$0xff] (!%p298_p2)  }
   0x6   : > { %301 = sbr.rel (%p298_p2) target bundleno = 1934 (0x78e), region = 56  ;;  %1755 = vset.pattern.permute.xlu0 (!%p298_p2), %v1790_v0  ;;  %367 = vst.msk [vmem:[#allocation2] sm:$0xf] (!%p298_p2), %vm366_vm0, %v1790_v0  ;;  %v1791_v5 = vmov (!%p298_p2), 0.0   ;;  %vm1792_vm2 = vmmov (!%p298_p2), 0   ;;  %vm426_vm4 = vcmask (!%p298_p2), 261120  }
   0x7   : > { %369 = vst.msk [vmem:[#allocation2 + $0x8] sm:$0xf0] (!%p298_p2), %vm368_vm1, %v1790_v0  ;;  %1609 = vmatprep.subr.bf16.mxu0 (!%p298_p2), %v1791_v5  ;;  %1613 = vmatprep.mubr.msk.bf16.mxu0 (!%p298_p2), %vm1792_vm2, %v1791_v5  ;;  %v1474_v6 = vld [vmem:[%s2091_s2] ss:$0 sm:$0xff] (!%p298_p2)  ;;  %vm396_vm3 = vsmask.f32 (!%p298_p2), 4352 }
   0x8   : > { %1610 = vmatpush3.bf16.msra.mxu0 (!%p298_p2), %v1756_v3  ;;  %1633 = vmatprep.subr.bf16.mxu1 (!%p298_p2), %v1791_v5  ;;  %v1758_v29 = vld [vmem:[%s2092_s3 + $0x10] sm:$0xff] (!%p298_p2)   ;;  %v1759_v31 = vld [vmem:[%s2092_s3 + $0x18] sm:$0xff] (!%p298_p2)   ;;  %vm487_vm5 = vcmask (!%p298_p2), 1043456   ;;  %v1760_v36 = vld [vmem:[%s2092_s3 + $0x20] sm:$0xff] (!%p298_p2)   ;;  %vm555_vm6 = vsmask.f32 (!%p298_p2), 3328 }
   0x9   : > { %1611 = vmatprep.subr.bf16.mxu0 (!%p298_p2), %v1791_v5  ;;  %1637 = vmatprep.mubr.msk.bf16.mxu1 (!%p298_p2), %vm1792_vm2, %v1791_v5  ;;  %v1761_v42 = vld [vmem:[%s2092_s3 + $0x28] sm:$0xff] (!%p298_p2)   ;;  %v1762_v50 = vld [vmem:[%s2094_s5] sm:$0xff] (!%p298_p2)   ;;  %v1764_v62 = vld [vmem:[%s2092_s3 + $0x30] sm:$0xff] (!%p298_p2)   ;;  %vm722_vm7 = vcmask (!%p298_p2), 1044480   ;;  %vm869_vm8 = vcmask (!%p298_p2), 1042432   ;;  %vm1024_vm9 = vcmask (!%p298_p2), 1045504  }
   0xa   : > { %1634 = vmatpush3.bf16.msra.mxu1 (!%p298_p2), %v1762_v50  ;;  %v1763_v51 = vld [vmem:[%s2094_s5 + $0x8] sm:$0xff] (!%p298_p2)   ;;  %v1478_v52 = vld [vmem:[%s2093_s4] ss:$0 sm:$0xff] (!%p298_p2)  ;;  %v1765_v63 = vld [vmem:[%s2092_s3 + $0x38] sm:$0xff] (!%p298_p2)   ;;  %vm1171_vm10 = vcmask (!%p298_p2), 1041408   ;;  %s1793_s29 = smov (!%p298_p2), 32  }
   0xb   : > { %1635 = vmatprep.subr.bf16.mxu1 (!%p298_p2), %v1791_v5  ;;  %v1493_v0 = vld [vmem:[%s2095_s6] ss:$0 sm:$0xff] (!%p298_p2) }
   0xc   : > { %1612 = vmatpush3.bf16.msra.mxu0 (!%p298_p2), %v1757_v4 }
   0xd   : > { %s2100_s10 = smov (!%p338_p3, %s1463_s10), 1  ;;  %1617 = vmatprep.subr.bf16.mxu0 %v1791_v5 }
   0xe   : > { %s1854_s11 = sshll.u32 %s2100_s10, 4  ;;  %1636 = vmatpush3.bf16.msra.mxu1 %v1763_v51 }
   0xf   : > { %s347_s14 = scalar_lea.vmem %s2090_s1, %s1854_s11  ;;  %s342_s21 = scalar_lea.vmem %s2089_s0, %s1854_s11  ;;  %1641 = vmatprep.subr.bf16.mxu1 %v1791_v5 }
  0x10   : > { %v354_v1 = vld [vmem:[%s347_s14] sm:$0xff]  ;;  %v355_v2 = vld [vmem:[%s347_s14 + $0x8] sm:$0xff]  ;;  %s352_s13 = scalar_lea.vmem %s2098_s9, %s1854_s11 }
  0x11   : > { %358 = vperm.xlu0 %1755, %v354_v1   ;;  %v370_v7 = vld [vmem:[%s342_s21] sm:$0xff]  ;;  %v371_v8 = vld [vmem:[%s342_s21 + $0x8] sm:$0xff] }
  0x12   : > { %v379_v10 = vadd.f32 %v1474_v6, %v370_v7  ;;  %v380_v11 = vadd.f32 %v1474_v6, %v371_v8 }
  0x15   : > { %363 = vperm.xlu0 %1755, %v355_v2  }
  0x90   : > { %v1881_v9 = vpop.permute.xlu0 %358 }
  0x91   : > { %v1886_v13 = vmul.f32 %v379_v10, %v1881_v9 }
  0x94   : > { %v1883_v12 = vpop.permute.xlu0 %363 }
  0x95   : > { %v1889_v14 = vmul.f32 %v380_v11, %v1883_v12 }
  0x97   : > { %v383_v15 = vpack.c.bf16 %v1889_v14, %v1886_v13 }
  0x99   : > { %v385_v16 = vrot.slane %v383_v15, 4 }
  0x9b   : > { %387 = vst.msk [vmem:[#allocation2] sm:$0xf0] %vm368_vm1, %v385_v16 }
  0x9c   : > { %388 = vst.msk [vmem:[#allocation2 + $0x8] sm:$0xf] %vm366_vm0, %v385_v16 }
  0xa2   : > { %v390_v17 = vld [vmem:[#allocation2] sm:$0xf8] }
  0xa3   : > { %v391_v18 = vld [vmem:[#allocation2 + $0x8] sm:$0xf]  ;;  %v398_v19 = vshrl.u32 %v390_v17, 16  ;;  %v401_v20 = vshll.u32 %v390_v17, 16  ;;  %v479_v32 = vld [vmem:[#allocation2] sm:$0xf0] }
  0xa4   : > { %v406_v21 = vshrl.u32 %v391_v18, 16  ;;  %v409_v22 = vshll.u32 %v391_v18, 16  ;;  %v488_v33 = vrot.slane %v479_v32, 4  ;;  %v489_v34 = vrot.slane %v391_v18, 4  ;;  %v549_v35 = vld [vmem:[#allocation2 + $0x8] sm:$0x1f] }
  0xa5   : > { %v400_v23 = vrot.slane %v398_v19, 3  ;;  %v403_v24 = vrot.slane %v401_v20, 4  ;;  %v557_v37 = vshrl.u32 %v479_v32, 16  ;;  %v560_v39 = vshll.u32 %v479_v32, 16 }
  0xa6   : > { %v408_v25 = vrot.slane %v406_v21, 3  ;;  %v411_v26 = vrot.slane %v409_v22, 4  ;;  %v490_v38 = vsel %vm487_vm5, %v488_v33, %v489_v34  ;;  %v565_v40 = vshrl.u32 %v549_v35, 16  ;;  %v1767_v22 = vld [vmem:[%s2092_s3 + $0x48] sm:$0xff]  }
  0xa7   : > { %v404_v27 = vor.u32 %v403_v24, %v400_v23  ;;  %v568_v41 = vshll.u32 %v549_v35, 16  ;;  %v559_v43 = vrot.slane %v557_v37, 4  ;;  %v562_v44 = vrot.slane %v560_v39, 5  ;;  %v1770_v35 = vld [vmem:[%s2094_s5 + $0x10] sm:$0xff]   ;;  %v1505_v37 = vld [vmem:[%s2093_s4 + $0x1] ss:$0 sm:$0xff] }
  0xa8   : > { %v412_v28 = vor.u32 %v411_v26, %v408_v25  ;;  %v567_v45 = vrot.slane %v565_v40, 4 }
  0xa9   : > { %v570_v46 = vrot.slane %v568_v41, 5  ;;  %v563_v47 = vor.u32 %v562_v44, %v559_v43 }
  0xaa   : > { %v413_v30 = vsel %vm396_vm3, %v404_v27, %v412_v28  ;;  %v1768_v27 = vld [vmem:[%s2092_s3 + $0x50] sm:$0xff]  }
  0xab   : > { %1614 = vmatmul.mubr.msk.bf16.vlgmr.msra.gmra.mrb[0].mxu0 %vm426_vm4, %v413_v30  ;;  %v571_v48 = vor.u32 %v570_v46, %v567_v45 }
  0xac   : > { %1618 = vmatpush3.bf16.msra.mxu0 %v1758_v29  ;;  %1621 = vmatprep.mubr.msk.bf16.mxu0 %vm1792_vm2, %v1791_v5  ;;  %v1769_v29 = vld [vmem:[%s2092_s3 + $0x58] sm:$0xff]  }
  0xad   : > { %1619 = vmatprep.subr.bf16.mxu0 %v1791_v5  ;;  %v572_v49 = vsel %vm555_vm6, %v563_v47, %v571_v48  ;;  %v1772_v47 = vld [vmem:[%s2092_s3 + $0x60] sm:$0xff]   ;;  %v1773_v48 = vld [vmem:[%s2092_s3 + $0x68] sm:$0xff]  }
  0xb0   : > { %1620 = vmatpush3.bf16.msra.mxu0 %v1759_v31 }
  0xb1   : > { %1625 = vmatprep.subr.bf16.mxu0 %v1791_v5 }
  0xb7   : > { %1622 = vmatmul.mubr.msk.bf16.vlgmr.msra.gmra.mrb[0].mxu0 %vm426_vm4, %v490_v38 }
  0xb8   : > { %1626 = vmatpush3.bf16.msra.mxu0 %v1760_v36  ;;  %1629 = vmatprep.mubr.msk.bf16.mxu0 %vm1792_vm2, %v1791_v5  ;;  %v1771_v36 = vld [vmem:[%s2094_s5 + $0x18] sm:$0xff]  }
  0xb9   : > { %1627 = vmatprep.subr.bf16.mxu0 %v1791_v5 }
  0xbc   : > { %1628 = vmatpush3.bf16.msra.mxu0 %v1761_v42 }
  0xbd   : > { %1665 = vmatprep.subr.bf16.mxu0 %v1791_v5 }
  0xc3   : > { %1630 = vmatmul.mubr.msk.bf16.vlgmr.msra.gmra.mrb[0].mxu0 %vm426_vm4, %v572_v49  ;;  %v1525_v49 = vld [vmem:[%s2095_s6 + $0x1] ss:$0 sm:$0xff] }
  0xc4   : > { %1669 = vmatprep.mubr.msk.bf16.mxu0 %vm1792_vm2, %v1791_v5  ;;  %1666 = vmatpush3.bf16.msra.mxu0 %v1770_v35 }
  0xc5   : > { %1667 = vmatprep.subr.bf16.mxu0 %v1791_v5 }
  0xc8   : > { %1668 = vmatpush3.bf16.msra.mxu0 %v1771_v36 }
  0xc9   : > { %1673 = vmatprep.subr.bf16.mxu0 %v1791_v5 }
 0x196   : > { %v622_v53 = vpop.f32.mrb[0].mxu0 }
 0x197   : > { %v1713_v54 = vadd.f32 %v1478_v52, %v622_v53  ;;  %v1631_v55 = vpop.f32.mrb[1].mxu0 }
 0x198   : > { %v625_v56 = vpop.f32.mrb[2].mxu0 }
 0x199   : > { %v1714_v57 = vadd.f32 %v1478_v52, %v625_v56  ;;  %v1632_v58 = vpop.f32.mrb[3].mxu0  ;;  %v631_v59 = vmax.f32 %v1713_v54, 0.0 }
 0x19b   : > { %v632_v60 = vmax.f32 %v1714_v57, 0.0 }
 0x19d   : > { %v637_v61 = vpack.c.bf16 %v632_v60, %v631_v59 }
 0x19f   : > { %1638 = vmatmul.mubr.msk.bf16.vlgmr.msra.gmra.mrb[0].mxu1 %vm426_vm4, %v637_v61 }
 0x1a0   : > { %1645 = vmatprep.mubr.msk.bf16.mxu1 %vm1792_vm2, %v1791_v5  ;;  %1642 = vmatpush3.bf16.msra.mxu1 %v1764_v62 }
 0x1a1   : > { %1643 = vmatprep.subr.bf16.mxu1 %v1791_v5 }
 0x1a4   : > { %1644 = vmatpush3.bf16.msra.mxu1 %v1765_v63 }
 0x1a5   : > { %1649 = vmatprep.subr.bf16.mxu1 %v1791_v5 }
 0x272   : > { %v694_v1 = vpop.f32.mrb[0].mxu1 }
 0x273   : > { %v695_v2 = vadd.f32 %v1493_v0, %v694_v1  ;;  %v1639_v3 = vpop.f32.mrb[1].mxu1 }
 0x274   : > { %v697_v4 = vpop.f32.mrb[2].mxu1 }
 0x275   : > { %v701_v6 = vadd.f32 %v695_v2, %v1886_v13  ;;  %v698_v7 = vadd.f32 %v1493_v0, %v697_v4  ;;  %v1640_v8 = vpop.f32.mrb[3].mxu1  ;;  %v1774_v2 = vld [vmem:[%s2092_s3 + $0x70] sm:$0xff]   ;;  %v1775_v4 = vld [vmem:[%s2092_s3 + $0x78] sm:$0xff]  }
 0x277   : > { %v702_v10 = vadd.f32 %v698_v7, %v1889_v14  ;;  %v1949_v11 = vmul.f32 %v701_v6, %v1881_v9  ;;  %v1766_v14 = vld [vmem:[%s2092_s3 + $0x40] sm:$0xff]  }
 0x279   : > { %v1952_v15 = vmul.f32 %v702_v10, %v1883_v12 }
 0x27b   : > { %v705_v16 = vpack.c.bf16 %v1952_v15, %v1949_v11 }
 0x27d   : > { %v707_v17 = vrot.slane %v705_v16, 4  ;;  %v1777_v16 = vld [vmem:[%s2092_s3 + $0x88] sm:$0xff]  }
 0x27f   : > { %709 = vst.msk [vmem:[#allocation2] sm:$0xf0] %vm368_vm1, %v707_v17 }
 0x280   : > { %710 = vst.msk [vmem:[#allocation2 + $0x8] sm:$0xf] %vm366_vm0, %v707_v17 }
 0x286   : > { %v713_v18 = vld [vmem:[#allocation2] sm:$0xf8] }
 0x287   : > { %v714_v13 = vld [vmem:[#allocation2 + $0x8] sm:$0x7]  ;;  %v723_v19 = vrot.slane %v713_v18, 3  ;;  %v790_v23 = vld [vmem:[#allocation2] sm:$0xf0] }
 0x288   : > { %v724_v20 = vrot.slane %v714_v13, 3  ;;  %v791_v24 = vld [vmem:[#allocation2 + $0x8] sm:$0xf]  ;;  %v799_v25 = vrot.slane %v790_v23, 4  ;;  %v860_v30 = vld [vmem:[#allocation2] sm:$0xe0] }
 0x289   : > { %v800_v26 = vrot.slane %v791_v24, 4  ;;  %v861_v31 = vld [vmem:[#allocation2 + $0x8] sm:$0x1f]  ;;  %v870_v32 = vrot.slane %v860_v30, 5 }
 0x28a   : > { %v725_v21 = vsel %vm722_vm7, %v723_v19, %v724_v20  ;;  %v871_v33 = vrot.slane %v861_v31, 5 }
 0x28b   : > { %1646 = vmatmul.mubr.msk.bf16.vlgmr.msra.gmra.mrb[4].mxu1 %vm426_vm4, %v725_v21  ;;  %v801_v28 = vsel %vm487_vm5, %v799_v25, %v800_v26  ;;  %v1779_v21 = vld [vmem:[%s2094_s5 + $0x28] sm:$0xff]  }
 0x28c   : > { %1650 = vmatpush3.bf16.msra.mxu1 %v1766_v14  ;;  %1653 = vmatprep.mubr.msk.bf16.mxu1 %vm1792_vm2, %v1791_v5  ;;  %v872_v34 = vsel %vm869_vm8, %v870_v32, %v871_v33  ;;  %v1778_v14 = vld [vmem:[%s2094_s5 + $0x20] sm:$0xff]   ;;  %v1781_v33 = vld [vmem:[%s2096_s7 + $0x8] sm:$0xff]  }
 0x28d   : > { %1651 = vmatprep.subr.bf16.mxu1 %v1791_v5  ;;  %v1780_v32 = vld [vmem:[%s2096_s7] sm:$0xff]  }
 0x290   : > { %1652 = vmatpush3.bf16.msra.mxu1 %v1767_v22  ;;  %v1537_v22 = vld [vmem:[%s2093_s4 + $0x2] ss:$0 sm:$0xff] }
 0x291   : > { %1657 = vmatprep.subr.bf16.mxu1 %v1791_v5 }
 0x297   : > { %1654 = vmatmul.mubr.msk.bf16.vlgmr.msra.gmra.mrb[4].mxu1 %vm426_vm4, %v801_v28 }
 0x298   : > { %1658 = vmatpush3.bf16.msra.mxu1 %v1768_v27  ;;  %1661 = vmatprep.mubr.msk.bf16.mxu1 %vm1792_vm2, %v1791_v5 }
 0x299   : > { %1659 = vmatprep.subr.bf16.mxu1 %v1791_v5 }
 0x29c   : > { %1660 = vmatpush3.bf16.msra.mxu1 %v1769_v29 }
 0x29d   : > { %1697 = vmatprep.subr.bf16.mxu1 %v1791_v5 }
 0x2a3   : > { %1662 = vmatmul.mubr.msk.bf16.vlgmr.msra.gmra.mrb[4].mxu1 %vm426_vm4, %v872_v34  ;;  %v1557_v34 = vld [vmem:[%s2095_s6 + $0x2] ss:$0 sm:$0xff] }
 0x2a4   : > { %1701 = vmatprep.mubr.msk.bf16.mxu1 %vm1792_vm2, %v1791_v5  ;;  %1698 = vmatpush3.bf16.msra.mxu1 %v1778_v14 }
 0x2a5   : > { %1699 = vmatprep.subr.bf16.mxu1 %v1791_v5 }
 0x2a8   : > { %1700 = vmatpush3.bf16.msra.mxu1 %v1779_v21 }
 0x2a9   : > { %1705 = vmatprep.subr.bf16.mxu1 %v1791_v5 }
 0x376   : > { %v922_v38 = vpop.f32.mrb[4].mxu1 }
 0x377   : > { %v1715_v39 = vadd.f32 %v1505_v37, %v922_v38  ;;  %v1663_v40 = vpop.f32.mrb[5].mxu1 }
 0x378   : > { %v925_v41 = vpop.f32.mrb[6].mxu1 }
 0x379   : > { %v1716_v42 = vadd.f32 %v1505_v37, %v925_v41  ;;  %v1664_v43 = vpop.f32.mrb[7].mxu1  ;;  %v931_v44 = vmax.f32 %v1715_v39, 0.0 }
 0x37b   : > { %v932_v45 = vmax.f32 %v1716_v42, 0.0 }
 0x37d   : > { %v938_v46 = vpack.c.bf16 %v932_v45, %v931_v44 }
 0x37f   : > { %1670 = vmatmul.mubr.msk.bf16.vlgmr.msra.gmra.mrb[4].mxu0 %vm426_vm4, %v938_v46  ;;  %v1561_v46 = vld [vmem:[%s2097_s8] ss:$0 sm:$0xff] }
 0x380   : > { %1677 = vmatprep.mubr.msk.bf16.mxu0 %vm1792_vm2, %v1791_v5  ;;  %1674 = vmatpush3.bf16.msra.mxu0 %v1772_v47 }
 0x381   : > { %1675 = vmatprep.subr.bf16.mxu0 %v1791_v5 }
 0x384   : > { %1676 = vmatpush3.bf16.msra.mxu0 %v1773_v48 }
 0x385   : > { %1681 = vmatprep.subr.bf16.mxu0 %v1791_v5 }
 0x452   : > { %v996_v50 = vpop.f32.mrb[4].mxu0 }
 0x453   : > { %v997_v51 = vadd.f32 %v1525_v49, %v996_v50  ;;  %v1671_v52 = vpop.f32.mrb[5].mxu0 }
 0x454   : > { %v999_v53 = vpop.f32.mrb[6].mxu0 }
 0x455   : > { %v1003_v54 = vadd.f32 %v997_v51, %v1949_v11  ;;  %v1000_v55 = vadd.f32 %v1525_v49, %v999_v53  ;;  %v1672_v56 = vpop.f32.mrb[7].mxu0  ;;  %v1776_v11 = vld [vmem:[%s2092_s3 + $0x80] sm:$0xff]  }
 0x457   : > { %v1004_v57 = vadd.f32 %v1000_v55, %v1952_v15  ;;  %v2012_v58 = vmul.f32 %v1003_v54, %v1881_v9 }
 0x459   : > { %v2015_v59 = vmul.f32 %v1004_v57, %v1883_v12 }
 0x45b   : > { %v1007_v60 = vpack.c.bf16 %v2015_v59, %v2012_v58 }
 0x45d   : > { %v1009_v61 = vrot.slane %v1007_v60, 4 }
 0x45f   : > { %1011 = vst.msk [vmem:[#allocation2] sm:$0xf0] %vm368_vm1, %v1009_v61 }
 0x460   : > { %1012 = vst.msk [vmem:[#allocation2 + $0x8] sm:$0xf] %vm366_vm0, %v1009_v61 }
 0x466   : > { %v1015_v62 = vld [vmem:[#allocation2] sm:$0xfc] }
 0x467   : > { %v1016_v63 = vld [vmem:[#allocation2 + $0x8] sm:$0x3]  ;;  %v1025_v0 = vrot.slane %v1015_v62, 2  ;;  %v1092_v6 = vld [vmem:[#allocation2] sm:$0xf0] }
 0x468   : > { %v1026_v1 = vrot.slane %v1016_v63, 2  ;;  %v1093_v7 = vld [vmem:[#allocation2 + $0x8] sm:$0xf]  ;;  %v1101_v8 = vrot.slane %v1092_v6, 4  ;;  %v1162_v17 = vld [vmem:[#allocation2] sm:$0xc0] }
 0x469   : > { %v1102_v10 = vrot.slane %v1093_v7, 4  ;;  %v1163_v18 = vld [vmem:[#allocation2 + $0x8] sm:$0x3f]  ;;  %v1172_v13 = vrot.slane %v1162_v17, 6 }
 0x46a   : > { %v1027_v3 = vsel %vm1024_vm9, %v1025_v0, %v1026_v1  ;;  %v1173_v19 = vrot.slane %v1163_v18, 6 }
 0x46b   : > { %1678 = vmatmul.mubr.msk.bf16.vlgmr.msra.gmra.mrb[8].mxu0 %vm426_vm4, %v1027_v3  ;;  %v1103_v15 = vsel %vm487_vm5, %v1101_v8, %v1102_v10 }
 0x46c   : > { %1682 = vmatpush3.bf16.msra.mxu0 %v1774_v2  ;;  %1685 = vmatprep.mubr.msk.bf16.mxu0 %vm1792_vm2, %v1791_v5  ;;  %v1174_v20 = vsel %vm1171_vm10, %v1172_v13, %v1173_v19 }
 0x46d   : > { %1683 = vmatprep.subr.bf16.mxu0 %v1791_v5 }
 0x470   : > { %1684 = vmatpush3.bf16.msra.mxu0 %v1775_v4 }
 0x471   : > { %1689 = vmatprep.subr.bf16.mxu0 %v1791_v5 }
 0x477   : > { %1686 = vmatmul.mubr.msk.bf16.vlgmr.msra.gmra.mrb[8].mxu0 %vm426_vm4, %v1103_v15 }
 0x478   : > { %1690 = vmatpush3.bf16.msra.mxu0 %v1776_v11  ;;  %1693 = vmatprep.mubr.msk.bf16.mxu0 %vm1792_vm2, %v1791_v5 }
 0x479   : > { %1691 = vmatprep.subr.bf16.mxu0 %v1791_v5 }
 0x47c   : > { %1692 = vmatpush3.bf16.msra.mxu0 %v1777_v16 }
 0x483   : > { %1694 = vmatmul.mubr.msk.bf16.vlgmr.msra.gmra.mrb[8].mxu0 %vm426_vm4, %v1174_v20 }
 0x556   : > { %v1224_v23 = vpop.f32.mrb[8].mxu0 }
 0x557   : > { %v1717_v24 = vadd.f32 %v1537_v22, %v1224_v23  ;;  %v1695_v25 = vpop.f32.mrb[9].mxu0 }
 0x558   : > { %v1227_v26 = vpop.f32.mrb[10].mxu0 }
 0x559   : > { %v1718_v27 = vadd.f32 %v1537_v22, %v1227_v26  ;;  %v1696_v28 = vpop.f32.mrb[11].mxu0  ;;  %v1233_v29 = vmax.f32 %v1717_v24, 0.0 }
 0x55b   : > { %v1234_v30 = vmax.f32 %v1718_v27, 0.0 }
 0x55d   : > { %v1240_v31 = vpack.c.bf16 %v1234_v30, %v1233_v29 }
 0x55f   : > { %1702 = vmatmul.mubr.msk.bf16.vlgmr.msra.gmra.mrb[8].mxu1 %vm426_vm4, %v1240_v31 }
 0x560   : > { %1709 = vmatprep.mubr.msk.bf16.mxu1 %vm1792_vm2, %v1791_v5  ;;  %1706 = vmatpush3.bf16.msra.mxu1 %v1780_v32 }
 0x561   : > { %1707 = vmatprep.subr.bf16.mxu1 %v1791_v5 }
 0x564   : > { %1708 = vmatpush3.bf16.msra.mxu1 %v1781_v33 }
 0x632   : > { %v1298_v35 = vpop.f32.mrb[8].mxu1 }
 0x633   : > { %v1299_v36 = vadd.f32 %v1557_v34, %v1298_v35  ;;  %v1703_v37 = vpop.f32.mrb[9].mxu1 }
 0x634   : > { %v1301_v38 = vpop.f32.mrb[10].mxu1 }
 0x635   : > { %v1305_v39 = vadd.f32 %v1299_v36, %v2012_v58  ;;  %v1302_v40 = vadd.f32 %v1557_v34, %v1301_v38  ;;  %v1704_v41 = vpop.f32.mrb[11].mxu1 }
 0x637   : > { %v1306_v42 = vadd.f32 %v1302_v40, %v2015_v59  ;;  %v1307_v5 = vmul.f32 %v1305_v39, %v1881_v9 }
 0x639   : > { %v1308_v43 = vmul.f32 %v1306_v42, %v1883_v12 }
 0x63b   : > { %v1309_v44 = vpack.c.bf16 %v1308_v43, %v1307_v5 }
 0x63d   : > { %v1311_v45 = vrot.slane %v1309_v44, 4  ;;  %1710 = vmatmul.mubr.msk.bf16.vlgmr.msra.gmra.mrb[12].mxu1 %vm426_vm4, %v1309_v44 }
 0x63f   : > { %1313 = vst.msk [vmem:[#allocation2] sm:$0xf0] %vm368_vm1, %v1311_v45 }
 0x640   : > { %1314 = vst.msk [vmem:[#allocation2 + $0x8] sm:$0xf] %vm366_vm0, %v1311_v45 }
 0x710   : > { %v1375_v47 = vpop.f32.mrb[12].mxu1 }
 0x711   : > { %v1376_v48 = vadd.f32 %v1561_v46, %v1375_v47  ;;  %v1711_v49 = vpop.f32.mrb[13].mxu1 }
 0x712   : > { %v1378_v50 = vpop.f32.mrb[14].mxu1 }
 0x713   : > { %1384 = vrot.lane.b32.xlu1 %v1376_v48, %s1793_s29  ;;  %v1712_v51 = vpop.f32.mrb[15].mxu1  ;;  %v1379_v52 = vadd.f32 %v1561_v46, %v1378_v50 }
 0x717   : > { %1386 = vrot.lane.b32.xlu1 %v1379_v52, %s1793_s29 }
 0x785   : > { %v1385_v53 = vpop.permute.xlu1 %1384 }
 0x786   : > { %v1390_v54 = vsel %vm426_vm4, %v1307_v5, %v1385_v53 }
 0x787   : > { %v1392_v55 = vmul.f32 %v1390_v54, %v1881_v9 }
 0x789   : > { %1394 = vst [vmem:[%s352_s13] sm:$0xff] %v1392_v55  ;;  %v1387_v56 = vpop.permute.xlu1 %1386 }
 0x78a   : > { %v1391_v57 = vsel %vm426_vm4, %v1308_v43, %v1387_v56 }
 0x78b   : > { %v1393_v58 = vmul.f32 %v1391_v57, %v1883_v12 }
 0x78d   : > { %1395 = vst [vmem:[%s352_s13 + $0x8] sm:$0xff] %v1393_v58 }
 0x78e PF: > { %s19_s30 = sadd.s32 1, %s1788_s30  }
 0x78f   : > { %p16_p4 = scmp.ge.s32.totalorder %s19_s30, 4  }
 0x791   :  { %18 = sbr.rel (!%p16_p4) target bundleno = 1 (0x1), region = 103 }

// kernel: multi_stage_forward.5
= control target key start
LH: loop header
LB: loop body
LE: loop exit
PB: predicated region body
PF: predicated region fallthrough
CT: control target
= control target key end

     0   :  { %s1981_s13 = smov 0   ;;  %s2242_s0 = inlined_call_operand.vmem [shape: f32[2,16,128], index: 0, kind: input, shape index: {}]   ;;  %s2243_s1 = inlined_call_operand.vmem [shape: f32[2,16,1], index: 1, kind: input, shape index: {}]   ;;  %s2244_s2 = inlined_call_operand.vmem [shape: bf16[6,32], index: 2, kind: input, shape index: {}]   ;;  %s2245_s3 = inlined_call_operand.vmem [shape: f32[1,32], index: 3, kind: input, shape index: {}]   ;;  %s2246_s4 = inlined_call_operand.vmem [shape: bf16[3,3,32,32], index: 4, kind: input, shape index: {}]   ;;  %s2247_s5 = inlined_call_operand.vmem [shape: f32[3,1,32], index: 5, kind: input, shape index: {}]   ;;  %s2248_s6 = inlined_call_operand.vmem [shape: bf16[3,32,32], index: 6, kind: input, shape index: {}]   ;;  %s2249_s7 = inlined_call_operand.vmem [shape: f32[3,1,32], index: 7, kind: input, shape index: {}]   ;;  %s2250_s8 = inlined_call_operand.vmem [shape: bf16[32,96], index: 8, kind: input, shape index: {}]   ;;  %s2251_s9 = inlined_call_operand.vmem [shape: f32[1,96], index: 9, kind: input, shape index: {}]   ;;  %s2252_s10 = inlined_call_operand.vmem [shape: f32[2,16,128], index: 10, kind: output, shape index: {}]  }
   0x1 LB: > { %s1575_s14 = sadd.s32 4294967295, %s1919_s13   ;;  %p1579_p0 = scmp.ge.s32.totalorder %s1919_s13, 1  ;;  %s1919_s13 = sphi %s1981_s13, %s20_s13  }
   0x2   : > { %p322_p1 = scmp.lt.s32.totalorder %s1919_s13, 3 }
   0x4   : > { %p323_p2 = pnand %p1579_p0, %p322_p1 }
   0x5   : > { %p365_p3 = scmp.lt.s32.totalorder (!%p323_p2), %s1575_s14, 1  ;;  %vm399_vm0 = vcmask (!%p323_p2), 310528   ;;  %vm393_vm1 = vcmask (!%p323_p2), 257024   ;;  %vm395_vm2 = vcmask (!%p323_p2), 261124   ;;  %v1921_v10 = vmov (!%p323_p2), 0   ;;  %s1922_s19 = smov (!%p323_p2), 96  }
   0x6   : > { %326 = sbr.rel (%p323_p2) target bundleno = 2568 (0xa08), region = 60  ;;  %1877 = vset.pattern.permute.xlu0 (!%p323_p2), %v1921_v10  ;;  %394 = vst.msk [vmem:[#allocation2] sm:$0xf] (!%p323_p2), %vm393_vm1, %v1921_v10  ;;  %1878 = vset.pattern.permute.xlu1 (!%p323_p2), %v1921_v10  ;;  %vm420_vm3 = vcmask (!%p323_p2), 48128   ;;  %v433_v19 = vld [vmem:[%s2244_s2] sm:$0x7] (!%p323_p2) }
   0x7   : > { %396 = vst.msk [vmem:[#allocation2 + $0x8] sm:$0xf0] (!%p323_p2), %vm395_vm2, %v1921_v10  ;;  %vm448_vm4 = vcmask (!%p323_p2), 1042432   ;;  %v1923_v20 = vmov (!%p323_p2), 0.0   ;;  %vm1924_vm5 = vmmov (!%p323_p2), 0   ;;  %v1879_v34 = vld [vmem:[%s2246_s4] sm:$0xff] (!%p323_p2)  }
   0x8   : > { %1724 = vmatprep.subr.bf16.mxu0 (!%p323_p2), %v1923_v20  ;;  %v450_v21 = vsel (!%p323_p2), %vm448_vm4, %v433_v19, 0  ;;  %1726 = vmatprep.mubr.msk.bf16.mxu0 (!%p323_p2), %vm1924_vm5, %v1923_v20  ;;  %v1880_v35 = vld [vmem:[%s2246_s4 + $0x8] sm:$0xff] (!%p323_p2)   ;;  %v1586_v36 = vld [vmem:[%s2245_s3] ss:$0 sm:$0xff] (!%p323_p2)  ;;  %vm508_vm6 = vsmask.f32 (!%p323_p2), 4352 }
   0x9   : > { %1725 = vmatpush3.bf16.msra.mxu0 (!%p323_p2), %v450_v21  ;;  %1730 = vmatprep.subr.bf16.mxu1 (!%p323_p2), %v1923_v20  ;;  %vm538_vm7 = vcmask (!%p323_p2), 261120   ;;  %v1881_v59 = vld [vmem:[%s2246_s4 + $0x10] sm:$0xff] (!%p323_p2)   ;;  %v1882_v61 = vld [vmem:[%s2246_s4 + $0x18] sm:$0xff] (!%p323_p2)   ;;  %vm599_vm8 = vcmask (!%p323_p2), 1043456   ;;  %vm667_vm9 = vsmask.f32 (!%p323_p2), 3328 }
   0xa   : > { %1734 = vmatprep.mubr.msk.bf16.mxu1 (!%p323_p2), %vm1924_vm5, %v1923_v20  ;;  %1754 = vmatprep.subr.bf16.mxu0 (!%p323_p2), %v1923_v20  ;;  %vm834_vm10 = vcmask (!%p323_p2), 1044480   ;;  %vm1136_vm11 = vcmask (!%p323_p2), 1045504   ;;  %vm1283_vm12 = vcmask (!%p323_p2), 1041408   ;;  %s1925_s21 = smov (!%p323_p2), 32  }
   0xb   : > { %1731 = vmatpush3.bf16.msra.mxu1 (!%p323_p2), %v1879_v34 }
   0xc   : > { %1732 = vmatprep.subr.bf16.mxu1 (!%p323_p2), %v1923_v20 }
   0xd   : > { %s2254_s14 = smov (!%p365_p3, %s1575_s14), 1 }
   0xe   : > { %s1989_s15 = sshll.u32 %s2254_s14, 4 }
   0xf   : > { %s369_s18 = scalar_lea.vmem %s2242_s0, %s1989_s15  ;;  %s374_s22 = scalar_lea.vmem %s2243_s1, %s1989_s15  ;;  %1733 = vmatpush3.bf16.msra.mxu1 %v1880_v35 }
  0x10   : > { %v397_v0 = vld [vmem:[%s369_s18] sm:$0xff]  ;;  %v398_v1 = vld [vmem:[%s369_s18 + $0x8] sm:$0xff]  ;;  %1738 = vmatprep.subr.bf16.mxu1 %v1923_v20  ;;  %s379_s24 = scalar_lea.vmem %s2252_s10, %s1989_s15 }
  0x11   : > { %v400_v2 = vsel %vm399_vm0, %v397_v0, -inf  ;;  %v403_v3 = vsel %vm399_vm0, %v398_v1, -inf  ;;  %v382_v17 = vld [vmem:[%s374_s22 + $0x8] sm:$0xff]  ;;  %v381_v18 = vld [vmem:[%s374_s22] sm:$0xff] }
  0x12   : > { %401 = vmax.xlane.f32.xlu0 %v400_v2  ;;  %v1883_v2 = vld [vmem:[%s2246_s4 + $0x20] sm:$0xff]  }
  0x16   : > { %404 = vmax.xlane.f32.xlu0 %v403_v3 }
  0x9f   : > { %v402_v4 = vpop.xlane.xlu0 %401 }
  0xa0   : > { %v406_v5 = vsub.f32 %v397_v0, %v402_v4 }
  0xa2   : > { %v408_v6 = vmul.f32 1.442695, %v406_v5 }
  0xa3   : > { %v405_v7 = vpop.xlane.xlu0 %404 }
  0xa4   : > { %1905 = vpow2.f32 %v408_v6  ;;  %v407_v8 = vsub.f32 %v398_v1, %v405_v7 }
  0xa6   : > { %v410_v9 = vmul.f32 1.442695, %v407_v8  ;;  %v1884_v8 = vld [vmem:[%s2246_s4 + $0x28] sm:$0xff]  }
  0xa8   : > { %1907 = vpow2.f32 %v410_v9 }
  0xae   : > { %v1906_v11 = vpop.eup %1905 }
  0xaf   : > { %414 = vrot.lane.b32.xlu1 %v1906_v11, %s1922_s19 }
  0xb2   : > { %v1908_v12 = vpop.eup %1907 }
  0xb3   : > { %416 = vrot.lane.b32.xlu1 %v1908_v12, %s1922_s19 }
 0x121   : > { %v415_v13 = vpop.permute.xlu1 %414 }
 0x122   : > { %v421_v14 = vsel %vm420_vm3, %v415_v13, 0.0 }
 0x123   : > { %422 = vadd.xlane.f32.xlu0 %v421_v14 }
 0x125   : > { %v417_v15 = vpop.permute.xlu1 %416 }
 0x126   : > { %v424_v16 = vsel %vm420_vm3, %v417_v15, 0.0 }
 0x127   : > { %425 = vadd.xlane.f32.xlu1 %v424_v16  ;;  %v1885_v16 = vld [vmem:[%s2248_s6] sm:$0xff]  }
 0x138   : > { %390 = vperm.xlu1 %1878, %v382_v17   ;;  %v1886_v17 = vld [vmem:[%s2248_s6 + $0x8] sm:$0xff]  }
 0x139   : > { %385 = vperm.xlu0 %1877, %v381_v18   ;;  %v1591_v18 = vld [vmem:[%s2247_s5] ss:$0 sm:$0xff] }
 0x1b0   : > { %v423_v22 = vpop.xlane.xlu0 %422 }
 0x1b1   : > { %1909 = vrcp.f32 %v423_v22 }
 0x1b4   : > { %v426_v23 = vpop.xlane.xlu1 %425 }
 0x1b5   : > { %1911 = vrcp.f32 %v426_v23 }
 0x1b8   : > { %v2016_v27 = vpop.permute.xlu0 %385  ;;  %v2018_v28 = vpop.permute.xlu1 %390 }
 0x1bb   : > { %v1910_v24 = vpop.eup %1909 }
 0x1bc   : > { %v428_v25 = vmul.f32 %v1910_v24, %v1906_v11 }
 0x1be   : > { %v431_v30 = vmul.f32 %v428_v25, %v2016_v27 }
 0x1bf   : > { %v1912_v26 = vpop.eup %1911 }
 0x1c0   : > { %v430_v29 = vmul.f32 %v1912_v26, %v1908_v12 }
 0x1c2   : > { %v432_v31 = vmul.f32 %v430_v29, %v2018_v28 }
 0x1c4   : > { %v434_v32 = vpack.c.bf16 %v432_v31, %v431_v30  ;;  %v1887_v31 = vld [vmem:[%s2246_s4 + $0x30] sm:$0xff]  }
 0x1c6   : > { %443 = vrot.lane.b32.xlu0 %v434_v32, %s1922_s19  ;;  %v1888_v32 = vld [vmem:[%s2246_s4 + $0x38] sm:$0xff]  }
 0x238   : > { %v444_v33 = vpop.permute.xlu0 %443 }
 0x239   : > { %1727 = vmatmul.mubr.msk.bf16.vlgmr.msra.gmra.mrb[0].mxu0 %vm420_vm3, %v444_v33  ;;  %v1606_v33 = vld [vmem:[%s2249_s7] ss:$0 sm:$0xff] }
 0x23a   : > { %1758 = vmatprep.mubr.msk.bf16.mxu0 %vm1924_vm5, %v1923_v20  ;;  %1755 = vmatpush3.bf16.msra.mxu0 %v1885_v16 }
 0x23b   : > { %1756 = vmatprep.subr.bf16.mxu0 %v1923_v20 }
 0x23e   : > { %1757 = vmatpush3.bf16.msra.mxu0 %v1886_v17 }
 0x23f   : > { %1762 = vmatprep.subr.bf16.mxu0 %v1923_v20 }
 0x30c   : > { %v486_v37 = vpop.f32.mrb[0].mxu0 }
 0x30d   : > { %v487_v38 = vadd.f32 %v1586_v36, %v486_v37  ;;  %v1728_v39 = vpop.f32.mrb[1].mxu0 }
 0x30e   : > { %v489_v40 = vpop.f32.mrb[2].mxu0 }
 0x30f   : > { %v490_v41 = vadd.f32 %v1586_v36, %v489_v40  ;;  %v1729_v42 = vpop.f32.mrb[3].mxu0  ;;  %v2038_v43 = vmul.f32 %v487_v38, %v2016_v27 }
 0x311   : > { %v2041_v44 = vmul.f32 %v490_v41, %v2018_v28 }
 0x313   : > { %v495_v45 = vpack.c.bf16 %v2041_v44, %v2038_v43 }
 0x315   : > { %v497_v46 = vrot.slane %v495_v45, 4 }
 0x317   : > { %499 = vst.msk [vmem:[#allocation2] sm:$0xf0] %vm395_vm2, %v497_v46 }
 0x318   : > { %500 = vst.msk [vmem:[#allocation2 + $0x8] sm:$0xf] %vm393_vm1, %v497_v46 }
 0x31e   : > { %v502_v47 = vld [vmem:[#allocation2] sm:$0xf8] }
 0x31f   : > { %v503_v48 = vld [vmem:[#allocation2 + $0x8] sm:$0xf]  ;;  %v510_v49 = vshrl.u32 %v502_v47, 16  ;;  %v513_v50 = vshll.u32 %v502_v47, 16  ;;  %v591_v62 = vld [vmem:[#allocation2] sm:$0xf0] }
 0x320   : > { %v518_v51 = vshrl.u32 %v503_v48, 16  ;;  %v521_v52 = vshll.u32 %v503_v48, 16  ;;  %v600_v63 = vrot.slane %v591_v62, 4  ;;  %v601_v0 = vrot.slane %v503_v48, 4  ;;  %v661_v1 = vld [vmem:[#allocation2 + $0x8] sm:$0x1f] }
 0x321   : > { %v512_v53 = vrot.slane %v510_v49, 3  ;;  %v515_v54 = vrot.slane %v513_v50, 4  ;;  %v669_v3 = vshrl.u32 %v591_v62, 16  ;;  %v672_v5 = vshll.u32 %v591_v62, 16 }
 0x322   : > { %v520_v55 = vrot.slane %v518_v51, 3  ;;  %v523_v56 = vrot.slane %v521_v52, 4  ;;  %v602_v4 = vsel %vm599_vm8, %v600_v63, %v601_v0  ;;  %v677_v6 = vshrl.u32 %v661_v1, 16  ;;  %v1890_v52 = vld [vmem:[%s2246_s4 + $0x48] sm:$0xff]  }
 0x323   : > { %v516_v57 = vor.u32 %v515_v54, %v512_v53  ;;  %v680_v7 = vshll.u32 %v661_v1, 16  ;;  %v671_v9 = vrot.slane %v669_v3, 4  ;;  %v674_v10 = vrot.slane %v672_v5, 5  ;;  %v1893_v1 = vld [vmem:[%s2248_s6 + $0x10] sm:$0xff]   ;;  %v1618_v3 = vld [vmem:[%s2247_s5 + $0x1] ss:$0 sm:$0xff] }
 0x324   : > { %v524_v58 = vor.u32 %v523_v56, %v520_v55  ;;  %v679_v11 = vrot.slane %v677_v6, 4 }
 0x325   : > { %v682_v12 = vrot.slane %v680_v7, 5  ;;  %v675_v13 = vor.u32 %v674_v10, %v671_v9 }
 0x326   : > { %v525_v60 = vsel %vm508_vm6, %v516_v57, %v524_v58  ;;  %v1891_v57 = vld [vmem:[%s2246_s4 + $0x50] sm:$0xff]  }
 0x327   : > { %1735 = vmatmul.mubr.msk.bf16.vlgmr.msra.gmra.mrb[0].mxu1 %vm538_vm7, %v525_v60  ;;  %v683_v14 = vor.u32 %v682_v12, %v679_v11 }
 0x328   : > { %1739 = vmatpush3.bf16.msra.mxu1 %v1881_v59  ;;  %1742 = vmatprep.mubr.msk.bf16.mxu1 %vm1924_vm5, %v1923_v20  ;;  %v1892_v59 = vld [vmem:[%s2246_s4 + $0x58] sm:$0xff]  }
 0x329   : > { %1740 = vmatprep.subr.bf16.mxu1 %v1923_v20  ;;  %v684_v15 = vsel %vm667_vm9, %v675_v13, %v683_v14  ;;  %v1895_v13 = vld [vmem:[%s2246_s4 + $0x60] sm:$0xff]   ;;  %v1896_v14 = vld [vmem:[%s2246_s4 + $0x68] sm:$0xff]  }
 0x32c   : > { %1741 = vmatpush3.bf16.msra.mxu1 %v1882_v61 }
 0x32d   : > { %1746 = vmatprep.subr.bf16.mxu1 %v1923_v20 }
 0x333   : > { %1743 = vmatmul.mubr.msk.bf16.vlgmr.msra.gmra.mrb[0].mxu1 %vm538_vm7, %v602_v4 }
 0x334   : > { %1747 = vmatpush3.bf16.msra.mxu1 %v1883_v2  ;;  %1750 = vmatprep.mubr.msk.bf16.mxu1 %vm1924_vm5, %v1923_v20  ;;  %v1894_v2 = vld [vmem:[%s2248_s6 + $0x18] sm:$0xff]  }
 0x335   : > { %1748 = vmatprep.subr.bf16.mxu1 %v1923_v20 }
 0x338   : > { %1749 = vmatpush3.bf16.msra.mxu1 %v1884_v8 }
 0x339   : > { %1786 = vmatprep.subr.bf16.mxu1 %v1923_v20 }
 0x33f   : > { %1751 = vmatmul.mubr.msk.bf16.vlgmr.msra.gmra.mrb[0].mxu1 %vm538_vm7, %v684_v15  ;;  %v1638_v15 = vld [vmem:[%s2249_s7 + $0x1] ss:$0 sm:$0xff] }
 0x340   : > { %1790 = vmatprep.mubr.msk.bf16.mxu1 %vm1924_vm5, %v1923_v20  ;;  %1787 = vmatpush3.bf16.msra.mxu1 %v1893_v1 }
 0x341   : > { %1788 = vmatprep.subr.bf16.mxu1 %v1923_v20 }
 0x344   : > { %1789 = vmatpush3.bf16.msra.mxu1 %v1894_v2 }
 0x345   : > { %1794 = vmatprep.subr.bf16.mxu1 %v1923_v20 }
 0x412   : > { %v734_v19 = vpop.f32.mrb[0].mxu1 }
 0x413   : > { %v1834_v21 = vadd.f32 %v1591_v18, %v734_v19  ;;  %v1752_v22 = vpop.f32.mrb[1].mxu1 }
 0x414   : > { %v737_v23 = vpop.f32.mrb[2].mxu1 }
 0x415   : > { %v1835_v24 = vadd.f32 %v1591_v18, %v737_v23  ;;  %v1753_v25 = vpop.f32.mrb[3].mxu1  ;;  %v743_v26 = vmax.f32 %v1834_v21, 0.0 }
 0x417   : > { %v744_v29 = vmax.f32 %v1835_v24, 0.0 }
 0x419   : > { %v749_v30 = vpack.c.bf16 %v744_v29, %v743_v26 }
 0x41b   : > { %1759 = vmatmul.mubr.msk.bf16.vlgmr.msra.gmra.mrb[4].mxu0 %vm538_vm7, %v749_v30 }
 0x41c   : > { %1766 = vmatprep.mubr.msk.bf16.mxu0 %vm1924_vm5, %v1923_v20  ;;  %1763 = vmatpush3.bf16.msra.mxu0 %v1887_v31 }
 0x41d   : > { %1764 = vmatprep.subr.bf16.mxu0 %v1923_v20 }
 0x420   : > { %1765 = vmatpush3.bf16.msra.mxu0 %v1888_v32 }
 0x421   : > { %1770 = vmatprep.subr.bf16.mxu0 %v1923_v20 }
 0x4ee   : > { %v806_v34 = vpop.f32.mrb[4].mxu0 }
 0x4ef   : > { %v807_v35 = vadd.f32 %v1606_v33, %v806_v34  ;;  %v1760_v36 = vpop.f32.mrb[5].mxu0 }
 0x4f0   : > { %v809_v37 = vpop.f32.mrb[6].mxu0 }
 0x4f1   : > { %v813_v38 = vadd.f32 %v807_v35, %v2038_v43  ;;  %v810_v39 = vadd.f32 %v1606_v33, %v809_v37  ;;  %v1761_v40 = vpop.f32.mrb[7].mxu0  ;;  %v1897_v35 = vld [vmem:[%s2246_s4 + $0x70] sm:$0xff]   ;;  %v1898_v37 = vld [vmem:[%s2246_s4 + $0x78] sm:$0xff]  }
 0x4f3   : > { %v814_v41 = vadd.f32 %v810_v39, %v2041_v44  ;;  %v2101_v42 = vmul.f32 %v813_v38, %v2016_v27  ;;  %v1889_v44 = vld [vmem:[%s2246_s4 + $0x40] sm:$0xff]  }
 0x4f5   : > { %v2104_v45 = vmul.f32 %v814_v41, %v2018_v28 }
 0x4f7   : > { %v817_v46 = vpack.c.bf16 %v2104_v45, %v2101_v42 }
 0x4f9   : > { %v819_v47 = vrot.slane %v817_v46, 4  ;;  %v1900_v46 = vld [vmem:[%s2246_s4 + $0x88] sm:$0xff]  }
 0x4fb   : > { %821 = vst.msk [vmem:[#allocation2] sm:$0xf0] %vm395_vm2, %v819_v47 }
 0x4fc   : > { %822 = vst.msk [vmem:[#allocation2 + $0x8] sm:$0xf] %vm393_vm1, %v819_v47 }
 0x502   : > { %v825_v48 = vld [vmem:[#allocation2] sm:$0xf8] }
 0x503   : > { %v826_v43 = vld [vmem:[#allocation2 + $0x8] sm:$0x7]  ;;  %v835_v49 = vrot.slane %v825_v48, 3  ;;  %v902_v53 = vld [vmem:[#allocation2] sm:$0xf0] }
 0x504   : > { %v836_v50 = vrot.slane %v826_v43, 3  ;;  %v903_v54 = vld [vmem:[#allocation2 + $0x8] sm:$0xf]  ;;  %v911_v55 = vrot.slane %v902_v53, 4  ;;  %v972_v60 = vld [vmem:[#allocation2] sm:$0xe0] }
 0x505   : > { %v912_v56 = vrot.slane %v903_v54, 4  ;;  %v973_v61 = vld [vmem:[#allocation2 + $0x8] sm:$0x1f]  ;;  %v982_v62 = vrot.slane %v972_v60, 5 }
 0x506   : > { %v837_v51 = vsel %vm834_vm10, %v835_v49, %v836_v50  ;;  %v983_v63 = vrot.slane %v973_v61, 5 }
 0x507   : > { %1767 = vmatmul.mubr.msk.bf16.vlgmr.msra.gmra.mrb[8].mxu0 %vm538_vm7, %v837_v51  ;;  %v913_v58 = vsel %vm599_vm8, %v911_v55, %v912_v56  ;;  %v1902_v51 = vld [vmem:[%s2248_s6 + $0x28] sm:$0xff]  }
 0x508   : > { %1771 = vmatpush3.bf16.msra.mxu0 %v1889_v44  ;;  %1774 = vmatprep.mubr.msk.bf16.mxu0 %vm1924_vm5, %v1923_v20  ;;  %v984_v0 = vsel %vm448_vm4, %v982_v62, %v983_v63  ;;  %v1901_v44 = vld [vmem:[%s2248_s6 + $0x20] sm:$0xff]   ;;  %v1904_v63 = vld [vmem:[%s2250_s8 + $0x8] sm:$0xff]  }
 0x509   : > { %1772 = vmatprep.subr.bf16.mxu0 %v1923_v20  ;;  %v1903_v62 = vld [vmem:[%s2250_s8] sm:$0xff]  }
 0x50c   : > { %1773 = vmatpush3.bf16.msra.mxu0 %v1890_v52  ;;  %v1650_v52 = vld [vmem:[%s2247_s5 + $0x2] ss:$0 sm:$0xff] }
 0x50d   : > { %1778 = vmatprep.subr.bf16.mxu0 %v1923_v20 }
 0x513   : > { %1775 = vmatmul.mubr.msk.bf16.vlgmr.msra.gmra.mrb[8].mxu0 %vm538_vm7, %v913_v58 }
 0x514   : > { %1779 = vmatpush3.bf16.msra.mxu0 %v1891_v57  ;;  %1782 = vmatprep.mubr.msk.bf16.mxu0 %vm1924_vm5, %v1923_v20 }
 0x515   : > { %1780 = vmatprep.subr.bf16.mxu0 %v1923_v20 }
 0x518   : > { %1781 = vmatpush3.bf16.msra.mxu0 %v1892_v59 }
 0x519   : > { %1818 = vmatprep.subr.bf16.mxu0 %v1923_v20 }
 0x51f   : > { %1783 = vmatmul.mubr.msk.bf16.vlgmr.msra.gmra.mrb[8].mxu0 %vm538_vm7, %v984_v0  ;;  %v1670_v0 = vld [vmem:[%s2249_s7 + $0x2] ss:$0 sm:$0xff] }
 0x520   : > { %1822 = vmatprep.mubr.msk.bf16.mxu0 %vm1924_vm5, %v1923_v20  ;;  %1819 = vmatpush3.bf16.msra.mxu0 %v1901_v44 }
 0x521   : > { %1820 = vmatprep.subr.bf16.mxu0 %v1923_v20 }
 0x524   : > { %1821 = vmatpush3.bf16.msra.mxu0 %v1902_v51 }
 0x525   : > { %1826 = vmatprep.subr.bf16.mxu0 %v1923_v20 }
 0x5f2   : > { %v1034_v4 = vpop.f32.mrb[8].mxu0 }
 0x5f3   : > { %v1836_v5 = vadd.f32 %v1618_v3, %v1034_v4  ;;  %v1784_v6 = vpop.f32.mrb[9].mxu0 }
 0x5f4   : > { %v1037_v7 = vpop.f32.mrb[10].mxu0 }
 0x5f5   : > { %v1837_v8 = vadd.f32 %v1618_v3, %v1037_v7  ;;  %v1785_v9 = vpop.f32.mrb[11].mxu0  ;;  %v1043_v10 = vmax.f32 %v1836_v5, 0.0 }
 0x5f7   : > { %v1044_v11 = vmax.f32 %v1837_v8, 0.0 }
 0x5f9   : > { %v1050_v12 = vpack.c.bf16 %v1044_v11, %v1043_v10 }
 0x5fb   : > { %1791 = vmatmul.mubr.msk.bf16.vlgmr.msra.gmra.mrb[4].mxu1 %vm538_vm7, %v1050_v12  ;;  %v1674_v12 = vld [vmem:[%s2251_s9] ss:$0 sm:$0xff] }
 0x5fc   : > { %1798 = vmatprep.mubr.msk.bf16.mxu1 %vm1924_vm5, %v1923_v20  ;;  %1795 = vmatpush3.bf16.msra.mxu1 %v1895_v13 }
 0x5fd   : > { %1796 = vmatprep.subr.bf16.mxu1 %v1923_v20 }
 0x600   : > { %1797 = vmatpush3.bf16.msra.mxu1 %v1896_v14 }
 0x601   : > { %1802 = vmatprep.subr.bf16.mxu1 %v1923_v20 }
 0x6ce   : > { %v1108_v16 = vpop.f32.mrb[4].mxu1 }
 0x6cf   : > { %v1109_v17 = vadd.f32 %v1638_v15, %v1108_v16  ;;  %v1792_v18 = vpop.f32.mrb[5].mxu1 }
 0x6d0   : > { %v1111_v19 = vpop.f32.mrb[6].mxu1 }
 0x6d1   : > { %v1115_v21 = vadd.f32 %v1109_v17, %v2101_v42  ;;  %v1112_v22 = vadd.f32 %v1638_v15, %v1111_v19  ;;  %v1793_v23 = vpop.f32.mrb[7].mxu1  ;;  %v1899_v42 = vld [vmem:[%s2246_s4 + $0x80] sm:$0xff]  }
 0x6d3   : > { %v1116_v24 = vadd.f32 %v1112_v22, %v2104_v45  ;;  %v2165_v25 = vmul.f32 %v1115_v21, %v2016_v27 }
 0x6d5   : > { %v2168_v26 = vmul.f32 %v1116_v24, %v2018_v28 }
 0x6d7   : > { %v1119_v29 = vpack.c.bf16 %v2168_v26, %v2165_v25 }
 0x6d9   : > { %v1121_v30 = vrot.slane %v1119_v29, 4 }
 0x6db   : > { %1123 = vst.msk [vmem:[#allocation2] sm:$0xf0] %vm395_vm2, %v1121_v30 }
 0x6dc   : > { %1124 = vst.msk [vmem:[#allocation2 + $0x8] sm:$0xf] %vm393_vm1, %v1121_v30 }
 0x6e2   : > { %v1127_v31 = vld [vmem:[#allocation2] sm:$0xfc] }
 0x6e3   : > { %v1128_v32 = vld [vmem:[#allocation2 + $0x8] sm:$0x3]  ;;  %v1137_v33 = vrot.slane %v1127_v31, 2  ;;  %v1204_v38 = vld [vmem:[#allocation2] sm:$0xf0] }
 0x6e4   : > { %v1138_v34 = vrot.slane %v1128_v32, 2  ;;  %v1205_v39 = vld [vmem:[#allocation2 + $0x8] sm:$0xf]  ;;  %v1213_v40 = vrot.slane %v1204_v38, 4  ;;  %v1274_v47 = vld [vmem:[#allocation2] sm:$0xc0] }
 0x6e5   : > { %v1214_v41 = vrot.slane %v1205_v39, 4  ;;  %v1275_v48 = vld [vmem:[#allocation2 + $0x8] sm:$0x3f]  ;;  %v1284_v43 = vrot.slane %v1274_v47, 6 }
 0x6e6   : > { %v1139_v36 = vsel %vm1136_vm11, %v1137_v33, %v1138_v34  ;;  %v1285_v49 = vrot.slane %v1275_v48, 6 }
 0x6e7   : > { %1799 = vmatmul.mubr.msk.bf16.vlgmr.msra.gmra.mrb[8].mxu1 %vm538_vm7, %v1139_v36  ;;  %v1215_v45 = vsel %vm599_vm8, %v1213_v40, %v1214_v41 }
 0x6e8   : > { %1803 = vmatpush3.bf16.msra.mxu1 %v1897_v35  ;;  %1806 = vmatprep.mubr.msk.bf16.mxu1 %vm1924_vm5, %v1923_v20  ;;  %v1286_v50 = vsel %vm1283_vm12, %v1284_v43, %v1285_v49 }
 0x6e9   : > { %1804 = vmatprep.subr.bf16.mxu1 %v1923_v20 }
 0x6ec   : > { %1805 = vmatpush3.bf16.msra.mxu1 %v1898_v37 }
 0x6ed   : > { %1810 = vmatprep.subr.bf16.mxu1 %v1923_v20 }
 0x6f3   : > { %1807 = vmatmul.mubr.msk.bf16.vlgmr.msra.gmra.mrb[8].mxu1 %vm538_vm7, %v1215_v45 }
 0x6f4   : > { %1811 = vmatpush3.bf16.msra.mxu1 %v1899_v42  ;;  %1814 = vmatprep.mubr.msk.bf16.mxu1 %vm1924_vm5, %v1923_v20 }
 0x6f5   : > { %1812 = vmatprep.subr.bf16.mxu1 %v1923_v20 }
 0x6f8   : > { %1813 = vmatpush3.bf16.msra.mxu1 %v1900_v46 }
 0x6ff   : > { %1815 = vmatmul.mubr.msk.bf16.vlgmr.msra.gmra.mrb[8].mxu1 %vm538_vm7, %v1286_v50 }
 0x7d2   : > { %v1336_v53 = vpop.f32.mrb[8].mxu1 }
 0x7d3   : > { %v1838_v54 = vadd.f32 %v1650_v52, %v1336_v53  ;;  %v1816_v55 = vpop.f32.mrb[9].mxu1 }
 0x7d4   : > { %v1339_v56 = vpop.f32.mrb[10].mxu1 }
 0x7d5   : > { %v1839_v57 = vadd.f32 %v1650_v52, %v1339_v56  ;;  %v1817_v58 = vpop.f32.mrb[11].mxu1  ;;  %v1345_v59 = vmax.f32 %v1838_v54, 0.0 }
 0x7d7   : > { %v1346_v60 = vmax.f32 %v1839_v57, 0.0 }
 0x7d9   : > { %v1352_v61 = vpack.c.bf16 %v1346_v60, %v1345_v59 }
 0x7db   : > { %1823 = vmatmul.mubr.msk.bf16.vlgmr.msra.gmra.mrb[12].mxu0 %vm538_vm7, %v1352_v61 }
 0x7dc   : > { %1830 = vmatprep.mubr.msk.bf16.mxu0 %vm1924_vm5, %v1923_v20  ;;  %1827 = vmatpush3.bf16.msra.mxu0 %v1903_v62 }
 0x7dd   : > { %1828 = vmatprep.subr.bf16.mxu0 %v1923_v20 }
 0x7e0   : > { %1829 = vmatpush3.bf16.msra.mxu0 %v1904_v63 }
 0x8ae   : > { %v1410_v1 = vpop.f32.mrb[12].mxu0 }
 0x8af   : > { %v1411_v2 = vadd.f32 %v1670_v0, %v1410_v1  ;;  %v1824_v3 = vpop.f32.mrb[13].mxu0 }
 0x8b0   : > { %v1413_v4 = vpop.f32.mrb[14].mxu0 }
 0x8b1   : > { %v1417_v5 = vadd.f32 %v1411_v2, %v2165_v25  ;;  %v1414_v6 = vadd.f32 %v1670_v0, %v1413_v4  ;;  %v1825_v7 = vpop.f32.mrb[15].mxu0 }
 0x8b3   : > { %v1418_v8 = vadd.f32 %v1414_v6, %v2168_v26  ;;  %v1419_v20 = vmul.f32 %v1417_v5, %v2016_v27 }
 0x8b5   : > { %v1420_v9 = vmul.f32 %v1418_v8, %v2018_v28 }
 0x8b7   : > { %v1421_v10 = vpack.c.bf16 %v1420_v9, %v1419_v20 }
 0x8b9   : > { %v1423_v11 = vrot.slane %v1421_v10, 4  ;;  %1831 = vmatmul.mubr.msk.bf16.vlgmr.msra.gmra.mrb[16].mxu0 %vm538_vm7, %v1421_v10 }
 0x8bb   : > { %1425 = vst.msk [vmem:[#allocation2] sm:$0xf0] %vm395_vm2, %v1423_v11 }
 0x8bc   : > { %1426 = vst.msk [vmem:[#allocation2 + $0x8] sm:$0xf] %vm393_vm1, %v1423_v11 }
 0x98c   : > { %v1487_v13 = vpop.f32.mrb[16].mxu0 }
 0x98d   : > { %v1488_v14 = vadd.f32 %v1674_v12, %v1487_v13  ;;  %v1832_v15 = vpop.f32.mrb[17].mxu0 }
 0x98e   : > { %v1490_v16 = vpop.f32.mrb[18].mxu0 }
 0x98f   : > { %v1491_v17 = vadd.f32 %v1674_v12, %v1490_v16  ;;  %1496 = vrot.lane.b32.xlu0 %v1488_v14, %s1925_s21  ;;  %v1833_v18 = vpop.f32.mrb[19].mxu0 }
 0x991   : > { %1498 = vrot.lane.b32.xlu1 %v1491_v17, %s1925_s21 }
 0xa01   : > { %v1497_v19 = vpop.permute.xlu0 %1496 }
 0xa02   : > { %v1502_v21 = vsel %vm538_vm7, %v1419_v20, %v1497_v19 }
 0xa03   : > { %v1504_v22 = vmul.f32 %v1502_v21, %v2016_v27  ;;  %v1499_v23 = vpop.permute.xlu1 %1498 }
 0xa04   : > { %v1503_v24 = vsel %vm538_vm7, %v1420_v9, %v1499_v23 }
 0xa05   : > { %1506 = vst [vmem:[%s379_s24] sm:$0xff] %v1504_v22  ;;  %v1505_v25 = vmul.f32 %v1503_v24, %v2018_v28 }
 0xa07   : > { %1507 = vst [vmem:[%s379_s24 + $0x8] sm:$0xff] %v1505_v25 }
 0xa08 PF: > { %s20_s13 = sadd.s32 1, %s1919_s13  }
 0xa09   : > { %p17_p4 = scmp.ge.s32.totalorder %s20_s13, 4  }
 0xa0b   :  { %19 = sbr.rel (!%p17_p4) target bundleno = 1 (0x1), region = 107 }

</bundles_post_ra>
